<compile_context>
chip_gen: v5e
topology: v5e:2x2
jax: 0.10.0
libtpu: 0.0.40
codegen_flags: <defaults>
</compile_context>

<pallas_src>
import functools
import math

import jax
import jax.numpy as jnp
from jax.experimental import pallas as pl
from jax.experimental.pallas import tpu as pltpu

EPS = 1e-5  # PyTorch LayerNorm default eps


def _layernorm(x, w):
    # LayerNorm(bias=False): center, normalize (population var), scale by w.
    mu = jnp.mean(x, axis=-1, keepdims=True)
    var = jnp.mean((x - mu) ** 2, axis=-1, keepdims=True)
    return (x - mu) * jax.lax.rsqrt(var + EPS) * w


def _vit_kernel(patches_ref, pe_w_ref, add_ref, mask_ref,
                ln1_ref, w_in_ref, w_out_ref, ln2_ref, ff1_ref, ff2_ref,
                lnh_ref, head_w_ref, head_b_ref, out_ref, x_ref,
                *, n_heads, batch_tile, seq_len):
    """Grid = (batch_tiles, n_layers); one encoder layer per grid step.

    patches_ref : [N, patch_dim]  (N = Bt*S, per-image row 0 is zero -> cls)
    add_ref     : [N, E]          (cls+pos for row 0, bias+pos for the rest)
    mask_ref    : [N, N]          additive block-diagonal (per-image) mask
    w_in_ref    : [3H, hd, E]     this layer's fused qkv weight (q pre-scaled)
    w_out_ref   : [E, E]          this layer's out_proj weight
    x_ref       : [N, E] f32      residual stream carried across the layer axis
    out_ref     : [Bt, A_pad]
    """
    H = n_heads
    N, E = x_ref.shape
    l = pl.program_id(1)

    # ---- patch embedding + fused (cls | bias) + positional add, at l == 0 ----
    @pl.when(l == 0)
    def _embed():
        x_ref[...] = jnp.einsum(
            'nd,ed->ne', patches_ref[...], pe_w_ref[...],
            preferred_element_type=jnp.float32) + add_ref[...]

    x = x_ref[...]                                               # [N, E] f32

    # ---- self-attention sub-block (norm_first, no biases) ----
    xn = _layernorm(x, ln1_ref[...]).astype(jnp.bfloat16)
    qkv = jnp.einsum('gde,ne->gdn', w_in_ref[...], xn,
                     preferred_element_type=jnp.float32)         # [3H, hd, N]
    q = jnp.swapaxes(qkv[0:H], 1, 2).astype(jnp.bfloat16)        # [H, N, hd]
    k = qkv[H:2 * H].astype(jnp.bfloat16)                        # [H, hd, N]
    v = qkv[2 * H:3 * H].astype(jnp.bfloat16)                    # [H, hd, N]

    s = jnp.einsum('hqd,hdk->hqk', q, k,
                   preferred_element_type=jnp.float32)           # [H, N, N]
    s = s + mask_ref[...]                  # no cross-image attention
    s = s - jnp.max(s, axis=-1, keepdims=True)
    p = jnp.exp(s)
    p = p / jnp.sum(p, axis=-1, keepdims=True)                   # exact divide
    o = jnp.einsum('hqk,hdk->hqd', p.astype(jnp.bfloat16), v,
                   preferred_element_type=jnp.float32)           # [H, N, hd]

    # concat heads, then one fused [N, E] @ [E, E] out-projection
    o = jnp.swapaxes(o, 0, 1).reshape(N, E).astype(jnp.bfloat16)
    x = x + jnp.einsum('ne,fe->nf', o, w_out_ref[...],
                       preferred_element_type=jnp.float32)

    # ---- feed-forward sub-block (norm_first, ReLU, no biases) ----
    xn = _layernorm(x, ln2_ref[...]).astype(jnp.bfloat16)
    mid = jnp.einsum('ne,fe->nf', xn, ff1_ref[...],
                     preferred_element_type=jnp.float32)
    mid = jnp.maximum(mid, 0.0).astype(jnp.bfloat16)
    x = x + jnp.einsum('nf,ef->ne', mid, ff2_ref[...],
                       preferred_element_type=jnp.float32)

    x_ref[...] = x

    # ---- mlp head on the cls rows, after the last layer ----
    @pl.when(l == pl.num_programs(1) - 1)
    def _head():
        cls = x.reshape(batch_tile, seq_len, E)[:, 0, :]          # [Bt, E]
        cls = _layernorm(cls, lnh_ref[...]).astype(jnp.bfloat16)
        out_ref[...] = jnp.einsum(
            'be,ae->ba', cls, head_w_ref[...],
            preferred_element_type=jnp.float32) + head_b_ref[...]


def image2patch(image, patch_size):
    """Exactly mirrors the PyTorch ViT.image2patch reshape/permute."""
    B, C, H, W = image.shape
    ps = patch_size
    p = image.reshape(B, C, H // ps, W // ps, ps, ps)
    p = jnp.transpose(p, (0, 2, 3, 4, 5, 1))
    return p.reshape(B, (H // ps) * (W // ps), ps * ps * C)


def vit_forward(image, params, *, patch_size, n_heads, n_layers,
                batch_tile=None):
    patches = image2patch(image, patch_size)                 # [B, P, patch_dim]
    B, P, patch_dim = patches.shape
    E = params['pe_w'].shape[0]
    L, H = n_layers, n_heads
    hd = E // H
    S = P + 1
    A = params['head_w'].shape[0]
    A_pad = ((A + 127) // 128) * 128                         # lane-dense output

    if batch_tile is None:
        batch_tile = 2 if B % 2 == 0 else 1
    Bt = batch_tile
    assert B % Bt == 0, "batch must be divisible by the batch tile"
    BT = B // Bt
    N = Bt * S

    f32, bf16 = jnp.float32, jnp.bfloat16

    # ---- wrapper-side preprocessing (layout / constant folding, plain XLA) ----
    # zero row per image in slot 0 so the in-kernel patch matmul leaves that
    # row free for the cls token; fold Bt images into one row block.
    patches_p = jnp.pad(patches, ((0, 0), (1, 0), (0, 0)))       # [B, S, pd]
    patches_t = patches_p.reshape(BT, N, patch_dim).astype(bf16)

    # fused additive term: row 0 = cls + pos[0]; rows 1.. = patch bias + pos.
    add_one = jnp.concatenate(
        [(params['cls'][0, 0] + params['pos'][0, 0])[None, :],
         params['pe_b'] + params['pos'][0, 1:S]], axis=0)        # [S, E]
    add_full = jnp.tile(add_one, (Bt, 1)).astype(f32)            # [N, E]

    # additive block-diagonal mask over the packed token axis.
    img_id = jnp.repeat(jnp.arange(Bt, dtype=jnp.int32), S)
    mask = jnp.where(img_id[:, None] == img_id[None, :],
                     0.0, -1e9).astype(f32)                      # [N, N]

    # PyTorch in_proj [L, 3E, E] -> stacked per-head [L, 3H, hd, E] with the
    # 1/sqrt(hd) attention scale folded into the q rows.
    w_in = params['inproj_w'].reshape(L, 3, H, hd, E)
    w_in = w_in.at[:, 0].multiply(1.0 / math.sqrt(hd))
    w_in = w_in.reshape(L, 3 * H, hd, E).astype(bf16)

    w_out = params['outproj_w'].astype(bf16)                     # [L, E, E]
    pe_w = params['pe_w'].astype(bf16)                           # [E, pd]
    ff1 = params['ff1_w'].astype(bf16)                           # [L, 4E, E]
    ff2 = params['ff2_w'].astype(bf16)                           # [L, E, 4E]

    head_w = jnp.zeros((A_pad, E), f32).at[:A].set(params['head_w']).astype(bf16)
    head_b = jnp.zeros((1, A_pad), f32).at[:, :A].set(params['head_b'])

    args = (patches_t, pe_w, add_full, mask,
            params['ln1_w'], w_in, w_out, params['ln2_w'], ff1, ff2,
            params['lnh_w'], head_w, head_b)

    def resident(arr):
        zeros = (0,) * arr.ndim
        return pl.BlockSpec(arr.shape, lambda b, l: zeros)

    def per_layer(arr):                       # stream one layer's weights
        zeros = (0,) * (arr.ndim - 1)
        return pl.BlockSpec((None,) + arr.shape[1:], lambda b, l: (l,) + zeros)

    in_specs = [
        pl.BlockSpec((None, N, patch_dim), lambda b, l: (b, 0, 0)),  # patches
        resident(pe_w), resident(add_full), resident(mask),
        per_layer(params['ln1_w']), per_layer(w_in), per_layer(w_out),
        per_layer(params['ln2_w']), per_layer(ff1), per_layer(ff2),
        resident(params['lnh_w']), resident(head_w), resident(head_b),
    ]

    kernel = functools.partial(_vit_kernel, n_heads=H, batch_tile=Bt,
                               seq_len=S)
    out = pl.pallas_call(
        kernel,
        out_shape=jax.ShapeDtypeStruct((BT, Bt, A_pad), f32),
        grid=(BT, L),
        in_specs=in_specs,
        out_specs=pl.BlockSpec((None, Bt, A_pad), lambda b, l: (b, 0, 0)),
        scratch_shapes=[pltpu.VMEM((N, E), f32)],
        compiler_params=pltpu.CompilerParams(
            dimension_semantics=("parallel", "arbitrary"),
            vmem_limit_bytes=32 * 1024 * 1024),
    )(*args)
    return out.reshape(B, A_pad)[:, :A]


def vit_reference(image, params, *, patch_size, n_heads, n_layers):
    """Pure-JAX (f32) faithful port of the PyTorch module (for validation)."""
    patches = image2patch(image, patch_size)
    B, P, _ = patches.shape
    E = params['pe_w'].shape[0]
    H = n_heads
    hd = E // H
    S = P + 1

    x = jnp.einsum('bpd,ed->bpe', patches, params['pe_w']) + params['pe_b']
    x = jnp.concatenate(
        [jnp.broadcast_to(params['cls'], (B, 1, E)), x], axis=1)
    x = x + params['pos'][:, :S]

    for l in range(n_layers):
        h = _layernorm(x, params['ln1_w'][l])
        qkv = jnp.einsum('bse,fe->bsf', h, params['inproj_w'][l])
        qkv = jnp.transpose(qkv.reshape(B, S, 3, H, hd), (2, 0, 3, 1, 4))
        q = qkv[0] * (1.0 / math.sqrt(hd))
        k, v = qkv[1], qkv[2]
        sc = jnp.einsum('bhqd,bhkd->bhqk', q, k)
        p = jax.nn.softmax(sc, axis=-1)
        o = jnp.einsum('bhqk,bhkd->bhqd', p, v)
        o = jnp.transpose(o, (0, 2, 1, 3)).reshape(B, S, E)
        x = x + jnp.einsum('bse,fe->bsf', o, params['outproj_w'][l])

        h = _layernorm(x, params['ln2_w'][l])
        h = jnp.maximum(jnp.einsum('bse,fe->bsf', h, params['ff1_w'][l]), 0.0)
        x = x + jnp.einsum('bsf,ef->bse', h, params['ff2_w'][l])

    cls = _layernorm(x[:, 0], params['lnh_w'])
    return jnp.einsum('be,ae->ba', cls, params['head_w']) + params['head_b']


def init_params(key, *, patch_dim, embed_dim, n_patches, n_layers, n_heads,
                action_space):
    E, L = embed_dim, n_layers
    ks = jax.random.split(key, 10)

    def nrm(k, shape, scale=0.02):
        return (scale * jax.random.normal(k, shape)).astype(jnp.float32)

    return dict(
        pe_w=nrm(ks[0], (E, patch_dim)),               # patch_embedding.weight
        pe_b=nrm(ks[1], (1, E)),                       # patch_embedding.bias
        cls=jax.random.normal(ks[2], (1, 1, E), jnp.float32),
        pos=jax.random.normal(ks[3], (1, n_patches + 1, E), jnp.float32),
        ln1_w=jnp.ones((L, 1, E), jnp.float32),        # norm1.weight (no bias)
        inproj_w=nrm(ks[4], (L, 3 * E, E)),            # self_attn.in_proj_weight
        outproj_w=nrm(ks[5], (L, E, E)),               # self_attn.out_proj.weight
        ln2_w=jnp.ones((L, 1, E), jnp.float32),        # norm2.weight (no bias)
        ff1_w=nrm(ks[6], (L, 4 * E, E)),               # linear1.weight
        ff2_w=nrm(ks[7], (L, E, 4 * E)),               # linear2.weight
        lnh_w=jnp.ones((1, E), jnp.float32),           # mlp_head LayerNorm.weight
        head_w=nrm(ks[8], (action_space, E)),          # mlp_head Linear.weight
        head_b=nrm(ks[9], (1, action_space)),          # mlp_head Linear.bias
    )


if __name__ == "__main__":
    key = jax.random.PRNGKey(0)
    # small shapes consistent with the module's constructor knobs; B=4 so the
    # batch-tiled parallel grid axis has an even extent (2 tiles of 2 images).
    B, C, Himg, Wimg = 4, 4, 16, 16
    patch_size, embed_dim, n_heads, n_layers, action_space = 8, 32, 4, 2, 5
    n_patches = (Himg // patch_size) * (Wimg // patch_size)
    patch_dim = C * patch_size * patch_size

    kimg, kpar = jax.random.split(key)
    image = jax.random.normal(kimg, (B, C, Himg, Wimg), jnp.float32)
    params = init_params(kpar, patch_dim=patch_dim, embed_dim=embed_dim,
                         n_patches=n_patches, n_layers=n_layers,
                         n_heads=n_heads, action_space=action_space)

    out = vit_forward(image, params, patch_size=patch_size,
                      n_heads=n_heads, n_layers=n_layers, batch_tile=2)
    out = jax.block_until_ready(out)

    ref = vit_reference(image, params, patch_size=patch_size,
                        n_heads=n_heads, n_layers=n_layers)

    assert out.shape == (B, action_space)
    assert bool(jnp.all(jnp.isfinite(out)))
    # kernel uses bf16 matmul operands with f32 accumulation vs a pure-f32 ref.
    assert jnp.allclose(out, ref, atol=2e-2, rtol=2e-2), (out, ref)
    print("KERNEL_OK")
</pallas_src>

<mosaic_0001>
module attributes {stable_mosaic.version = 11 : i64} {
  func.func @_vit_kernel(%arg0: i32, %arg1: i32, %arg2: memref<1x10x256xbf16, #tpu.memory_space<vmem>>, %arg3: memref<32x256xbf16, #tpu.memory_space<vmem>>, %arg4: memref<10x32xf32, #tpu.memory_space<vmem>>, %arg5: memref<10x10xf32, #tpu.memory_space<vmem>>, %arg6: memref<1x1x32xf32, #tpu.memory_space<vmem>>, %arg7: memref<1x12x8x32xbf16, #tpu.memory_space<vmem>>, %arg8: memref<1x32x32xbf16, #tpu.memory_space<vmem>>, %arg9: memref<1x1x32xf32, #tpu.memory_space<vmem>>, %arg10: memref<1x128x32xbf16, #tpu.memory_space<vmem>>, %arg11: memref<1x32x128xbf16, #tpu.memory_space<vmem>>, %arg12: memref<1x32xf32, #tpu.memory_space<vmem>>, %arg13: memref<128x32xbf16, #tpu.memory_space<vmem>>, %arg14: memref<1x128xf32, #tpu.memory_space<vmem>>, %arg15: memref<1x2x128xf32, #tpu.memory_space<vmem>>, %arg16: memref<10x32xf32, #tpu.memory_space<vmem>>) attributes {dimension_semantics = [#tpu.dimension_semantics<parallel>, #tpu.dimension_semantics<arbitrary>], iteration_bounds = array<i64: 2, 2>, scalar_prefetch = 0 : i64, scratch_operands = 1 : i64, tpu.core_type = #tpu.core_type<tc>, window_params = [{transform_indices = @transform_0, window_bounds = array<i64: 1, 10, 256>}, {pipeline_mode = #tpu.pipeline_mode<synchronous>, transform_indices = @transform_1, window_bounds = array<i64: 32, 256>}, {pipeline_mode = #tpu.pipeline_mode<synchronous>, transform_indices = @transform_2, window_bounds = array<i64: 10, 32>}, {pipeline_mode = #tpu.pipeline_mode<synchronous>, transform_indices = @transform_3, window_bounds = array<i64: 10, 10>}, {transform_indices = @transform_4, window_bounds = array<i64: 1, 1, 32>}, {transform_indices = @transform_5, window_bounds = array<i64: 1, 12, 8, 32>}, {transform_indices = @transform_6, window_bounds = array<i64: 1, 32, 32>}, {transform_indices = @transform_7, window_bounds = array<i64: 1, 1, 32>}, {transform_indices = @transform_8, window_bounds = array<i64: 1, 128, 32>}, {transform_indices = @transform_9, window_bounds = array<i64: 1, 32, 128>}, {pipeline_mode = #tpu.pipeline_mode<synchronous>, transform_indices = @transform_10, window_bounds = array<i64: 1, 32>}, {pipeline_mode = #tpu.pipeline_mode<synchronous>, transform_indices = @transform_11, window_bounds = array<i64: 128, 32>}, {pipeline_mode = #tpu.pipeline_mode<synchronous>, transform_indices = @transform_12, window_bounds = array<i64: 1, 128>}, {transform_indices = @transform_13, window_bounds = array<i64: 1, 2, 128>}]} {
    %c0_i32 = arith.constant 0 : i32
    %0 = arith.cmpi eq, %arg1, %c0_i32 : i32
    %1 = arith.extui %0 : i1 to i32
    %c0_i32_0 = arith.constant 0 : i32
    %2 = arith.cmpi ne, %1, %c0_i32_0 : i32
    scf.if %2 {
      %c0_44 = arith.constant 0 : index
      %c0_45 = arith.constant 0 : index
      %c0_46 = arith.constant 0 : index
      %97 = vector.load %arg2[%c0_44, %c0_45, %c0_46] : memref<1x10x256xbf16, #tpu.memory_space<vmem>>, vector<1x10x256xbf16>
      %98 = vector.shape_cast %97 : vector<1x10x256xbf16> to vector<10x256xbf16>
      %c0_47 = arith.constant 0 : index
      %c0_48 = arith.constant 0 : index
      %99 = vector.load %arg3[%c0_47, %c0_48] : memref<32x256xbf16, #tpu.memory_space<vmem>>, vector<32x256xbf16>
      "tpu.trace_start"() <{level = 10 : i32, message = "nd,ed->ne"}> : () -> ()
      %cst_49 = arith.constant dense<0.000000e+00> : vector<10x32xf32>
      %100 = tpu.matmul %98, %99, %cst_49 {dimension_numbers = #tpu.dot_dimension_numbers<[1], [1], [0], [0], [0, 0, 1, 0], [], []>} : vector<10x256xbf16>, vector<32x256xbf16>, vector<10x32xf32> -> vector<10x32xf32>
      "tpu.trace_stop"() : () -> ()
      %c0_50 = arith.constant 0 : index
      %c0_51 = arith.constant 0 : index
      %101 = vector.load %arg4[%c0_50, %c0_51] : memref<10x32xf32, #tpu.memory_space<vmem>>, vector<10x32xf32>
      %102 = arith.addf %100, %101 : vector<10x32xf32>
      %c0_52 = arith.constant 0 : index
      %c0_53 = arith.constant 0 : index
      %103 = vector.load %arg16[%c0_52, %c0_53] : memref<10x32xf32, #tpu.memory_space<vmem>>, vector<10x32xf32>
      tpu.vector_store %arg16[%c0_52, %c0_53], %102 {strides = array<i32>} : memref<10x32xf32, #tpu.memory_space<vmem>>, vector<10x32xf32>,
    } else {
    }
    %c0 = arith.constant 0 : index
    %c0_1 = arith.constant 0 : index
    %3 = vector.load %arg16[%c0, %c0_1] : memref<10x32xf32, #tpu.memory_space<vmem>>, vector<10x32xf32>
    %c0_2 = arith.constant 0 : index
    %c0_3 = arith.constant 0 : index
    %c0_4 = arith.constant 0 : index
    %4 = vector.load %arg6[%c0_2, %c0_3, %c0_4] : memref<1x1x32xf32, #tpu.memory_space<vmem>>, vector<1x1x32xf32>
    %5 = vector.shape_cast %4 : vector<1x1x32xf32> to vector<1x32xf32>
    %cst = arith.constant dense<0.000000e+00> : vector<10xf32>
    %6 = vector.multi_reduction <add>, %3, %cst [1] : vector<10x32xf32> to vector<10xf32>
    %7 = vector.shape_cast %6 : vector<10xf32> to vector<10x1xf32>
    %cst_5 = arith.constant 3.200000e+01 : f32
    %8 = vector.broadcast %cst_5 : f32 to vector<10x1xf32>
    %9 = arith.divf %7, %8 : vector<10x1xf32>
    %10 = vector.broadcast %9 : vector<10x1xf32> to vector<10x32xf32>
    %11 = arith.subf %3, %10 : vector<10x32xf32>
    %12 = arith.mulf %11, %11 : vector<10x32xf32>
    %cst_6 = arith.constant dense<0.000000e+00> : vector<10xf32>
    %13 = vector.multi_reduction <add>, %12, %cst_6 [1] : vector<10x32xf32> to vector<10xf32>
    %14 = vector.shape_cast %13 : vector<10xf32> to vector<10x1xf32>
    %cst_7 = arith.constant 3.200000e+01 : f32
    %15 = vector.broadcast %cst_7 : f32 to vector<10x1xf32>
    %16 = arith.divf %14, %15 : vector<10x1xf32>
    %17 = vector.broadcast %9 : vector<10x1xf32> to vector<10x32xf32>
    %18 = arith.subf %3, %17 : vector<10x32xf32>
    %cst_8 = arith.constant 9.99999974E-6 : f32
    %19 = vector.broadcast %cst_8 : f32 to vector<10x1xf32>
    %20 = arith.addf %16, %19 : vector<10x1xf32>
    %21 = math.rsqrt %20 : vector<10x1xf32>
    %22 = vector.broadcast %21 : vector<10x1xf32> to vector<10x32xf32>
    %23 = arith.mulf %18, %22 : vector<10x32xf32>
    %24 = vector.broadcast %5 : vector<1x32xf32> to vector<10x32xf32>
    %25 = arith.mulf %23, %24 : vector<10x32xf32>
    %26 = arith.truncf %25 : vector<10x32xf32> to vector<10x32xbf16>
    %c0_9 = arith.constant 0 : index
    %c0_10 = arith.constant 0 : index
    %c0_11 = arith.constant 0 : index
    %c0_12 = arith.constant 0 : index
    %27 = vector.load %arg7[%c0_9, %c0_10, %c0_11, %c0_12] : memref<1x12x8x32xbf16, #tpu.memory_space<vmem>>, vector<1x12x8x32xbf16>
    %28 = vector.shape_cast %27 : vector<1x12x8x32xbf16> to vector<12x8x32xbf16>
    "tpu.trace_start"() <{level = 10 : i32, message = "gde,ne->gdn"}> : () -> ()
    %cst_13 = arith.constant dense<0.000000e+00> : vector<12x8x10xf32>
    %29 = tpu.matmul %28, %26, %cst_13 {dimension_numbers = #tpu.dot_dimension_numbers<[2], [1], [0, 1], [0], [0, 0, 0, 1, 1, 0], [], []>} : vector<12x8x32xbf16>, vector<10x32xbf16>, vector<12x8x10xf32> -> vector<12x8x10xf32>
    "tpu.trace_stop"() : () -> ()
    %30 = vector.extract_strided_slice %29 {offsets = [0, 0, 0], sizes = [4, 8, 10], strides = [1, 1, 1]} : vector<12x8x10xf32> to vector<4x8x10xf32>
    %31 = tpu.transpose %30, [0, 2, 1] : vector<4x8x10xf32> -> vector<4x10x8xf32>
    %32 = arith.truncf %31 : vector<4x10x8xf32> to vector<4x10x8xbf16>
    %33 = vector.extract_strided_slice %29 {offsets = [4, 0, 0], sizes = [4, 8, 10], strides = [1, 1, 1]} : vector<12x8x10xf32> to vector<4x8x10xf32>
    %34 = arith.truncf %33 : vector<4x8x10xf32> to vector<4x8x10xbf16>
    %35 = vector.extract_strided_slice %29 {offsets = [8, 0, 0], sizes = [4, 8, 10], strides = [1, 1, 1]} : vector<12x8x10xf32> to vector<4x8x10xf32>
    %36 = arith.truncf %35 : vector<4x8x10xf32> to vector<4x8x10xbf16>
    "tpu.trace_start"() <{level = 10 : i32, message = "hqd,hdk->hqk"}> : () -> ()
    %cst_14 = arith.constant dense<0.000000e+00> : vector<4x10x10xf32>
    %37 = tpu.matmul %32, %34, %cst_14 {dimension_numbers = #tpu.dot_dimension_numbers<[2], [1], [1], [2], [0, 0, 0, 1, 1, 2], [0], [0]>} : vector<4x10x8xbf16>, vector<4x8x10xbf16>, vector<4x10x10xf32> -> vector<4x10x10xf32>
    "tpu.trace_stop"() : () -> ()
    %c0_15 = arith.constant 0 : index
    %c0_16 = arith.constant 0 : index
    %38 = vector.load %arg5[%c0_15, %c0_16] : memref<10x10xf32, #tpu.memory_space<vmem>>, vector<10x10xf32>
    %39 = vector.shape_cast %38 : vector<10x10xf32> to vector<1x10x10xf32>
    %40 = vector.broadcast %39 : vector<1x10x10xf32> to vector<4x10x10xf32>
    %41 = arith.addf %37, %40 : vector<4x10x10xf32>
    %cst_17 = arith.constant dense<0xFF800000> : vector<4x10xf32>
    %42 = vector.multi_reduction <maximumf>, %41, %cst_17 [2] : vector<4x10x10xf32> to vector<4x10xf32>
    %43 = vector.shape_cast %42 : vector<4x10xf32> to vector<4x10x1xf32>
    %44 = vector.broadcast %43 : vector<4x10x1xf32> to vector<4x10x10xf32>
    %45 = arith.subf %41, %44 : vector<4x10x10xf32>
    %46 = math.exp %45 : vector<4x10x10xf32>
    %cst_18 = arith.constant dense<0.000000e+00> : vector<4x10xf32>
    %47 = vector.multi_reduction <add>, %46, %cst_18 [2] : vector<4x10x10xf32> to vector<4x10xf32>
    %48 = vector.shape_cast %47 : vector<4x10xf32> to vector<4x10x1xf32>
    %49 = vector.broadcast %48 : vector<4x10x1xf32> to vector<4x10x10xf32>
    %50 = arith.divf %46, %49 : vector<4x10x10xf32>
    %51 = arith.truncf %50 : vector<4x10x10xf32> to vector<4x10x10xbf16>
    "tpu.trace_start"() <{level = 10 : i32, message = "hqk,hdk->hqd"}> : () -> ()
    %cst_19 = arith.constant dense<0.000000e+00> : vector<4x10x8xf32>
    %52 = tpu.matmul %51, %36, %cst_19 {dimension_numbers = #tpu.dot_dimension_numbers<[2], [2], [1], [1], [0, 0, 0, 1, 1, 1], [0], [0]>} : vector<4x10x10xbf16>, vector<4x8x10xbf16>, vector<4x10x8xf32> -> vector<4x10x8xf32>
    "tpu.trace_stop"() : () -> ()
    %53 = tpu.transpose %52, [1, 0, 2] : vector<4x10x8xf32> -> vector<10x4x8xf32>
    %54 = vector.shape_cast %53 : vector<10x4x8xf32> to vector<10x32xf32>
    %55 = arith.truncf %54 : vector<10x32xf32> to vector<10x32xbf16>
    %c0_20 = arith.constant 0 : index
    %c0_21 = arith.constant 0 : index
    %c0_22 = arith.constant 0 : index
    %56 = vector.load %arg8[%c0_20, %c0_21, %c0_22] : memref<1x32x32xbf16, #tpu.memory_space<vmem>>, vector<1x32x32xbf16>
    %57 = vector.shape_cast %56 : vector<1x32x32xbf16> to vector<32x32xbf16>
    "tpu.trace_start"() <{level = 10 : i32, message = "ne,fe->nf"}> : () -> ()
    %cst_23 = arith.constant dense<0.000000e+00> : vector<10x32xf32>
    %58 = tpu.matmul %55, %57, %cst_23 {dimension_numbers = #tpu.dot_dimension_numbers<[1], [1], [0], [0], [0, 0, 1, 0], [], []>} : vector<10x32xbf16>, vector<32x32xbf16>, vector<10x32xf32> -> vector<10x32xf32>
    "tpu.trace_stop"() : () -> ()
    %59 = arith.addf %3, %58 : vector<10x32xf32>
    %c0_24 = arith.constant 0 : index
    %c0_25 = arith.constant 0 : index
    %c0_26 = arith.constant 0 : index
    %60 = vector.load %arg9[%c0_24, %c0_25, %c0_26] : memref<1x1x32xf32, #tpu.memory_space<vmem>>, vector<1x1x32xf32>
    %61 = vector.shape_cast %60 : vector<1x1x32xf32> to vector<1x32xf32>
    %cst_27 = arith.constant dense<0.000000e+00> : vector<10xf32>
    %62 = vector.multi_reduction <add>, %59, %cst_27 [1] : vector<10x32xf32> to vector<10xf32>
    %63 = vector.shape_cast %62 : vector<10xf32> to vector<10x1xf32>
    %cst_28 = arith.constant 3.200000e+01 : f32
    %64 = vector.broadcast %cst_28 : f32 to vector<10x1xf32>
    %65 = arith.divf %63, %64 : vector<10x1xf32>
    %66 = vector.broadcast %65 : vector<10x1xf32> to vector<10x32xf32>
    %67 = arith.subf %59, %66 : vector<10x32xf32>
    %68 = arith.mulf %67, %67 : vector<10x32xf32>
    %cst_29 = arith.constant dense<0.000000e+00> : vector<10xf32>
    %69 = vector.multi_reduction <add>, %68, %cst_29 [1] : vector<10x32xf32> to vector<10xf32>
    %70 = vector.shape_cast %69 : vector<10xf32> to vector<10x1xf32>
    %cst_30 = arith.constant 3.200000e+01 : f32
    %71 = vector.broadcast %cst_30 : f32 to vector<10x1xf32>
    %72 = arith.divf %70, %71 : vector<10x1xf32>
    %73 = vector.broadcast %65 : vector<10x1xf32> to vector<10x32xf32>
    %74 = arith.subf %59, %73 : vector<10x32xf32>
    %cst_31 = arith.constant 9.99999974E-6 : f32
    %75 = vector.broadcast %cst_31 : f32 to vector<10x1xf32>
    %76 = arith.addf %72, %75 : vector<10x1xf32>
    %77 = math.rsqrt %76 : vector<10x1xf32>
    %78 = vector.broadcast %77 : vector<10x1xf32> to vector<10x32xf32>
    %79 = arith.mulf %74, %78 : vector<10x32xf32>
    %80 = vector.broadcast %61 : vector<1x32xf32> to vector<10x32xf32>
    %81 = arith.mulf %79, %80 : vector<10x32xf32>
    %82 = arith.truncf %81 : vector<10x32xf32> to vector<10x32xbf16>
    %c0_32 = arith.constant 0 : index
    %c0_33 = arith.constant 0 : index
    %c0_34 = arith.constant 0 : index
    %83 = vector.load %arg10[%c0_32, %c0_33, %c0_34] : memref<1x128x32xbf16, #tpu.memory_space<vmem>>, vector<1x128x32xbf16>
    %84 = vector.shape_cast %83 : vector<1x128x32xbf16> to vector<128x32xbf16>
    "tpu.trace_start"() <{level = 10 : i32, message = "ne,fe->nf"}> : () -> ()
    %cst_35 = arith.constant dense<0.000000e+00> : vector<10x128xf32>
    %85 = tpu.matmul %82, %84, %cst_35 {dimension_numbers = #tpu.dot_dimension_numbers<[1], [1], [0], [0], [0, 0, 1, 0], [], []>} : vector<10x32xbf16>, vector<128x32xbf16>, vector<10x128xf32> -> vector<10x128xf32>
    "tpu.trace_stop"() : () -> ()
    %cst_36 = arith.constant 0.000000e+00 : f32
    %86 = vector.broadcast %cst_36 : f32 to vector<10x128xf32>
    %87 = arith.maximumf %85, %86 : vector<10x128xf32>
    %88 = arith.truncf %87 : vector<10x128xf32> to vector<10x128xbf16>
    %c0_37 = arith.constant 0 : index
    %c0_38 = arith.constant 0 : index
    %c0_39 = arith.constant 0 : index
    %89 = vector.load %arg11[%c0_37, %c0_38, %c0_39] : memref<1x32x128xbf16, #tpu.memory_space<vmem>>, vector<1x32x128xbf16>
    %90 = vector.shape_cast %89 : vector<1x32x128xbf16> to vector<32x128xbf16>
    "tpu.trace_start"() <{level = 10 : i32, message = "nf,ef->ne"}> : () -> ()
    %cst_40 = arith.constant dense<0.000000e+00> : vector<10x32xf32>
    %91 = tpu.matmul %88, %90, %cst_40 {dimension_numbers = #tpu.dot_dimension_numbers<[1], [1], [0], [0], [0, 0, 1, 0], [], []>} : vector<10x128xbf16>, vector<32x128xbf16>, vector<10x32xf32> -> vector<10x32xf32>
    "tpu.trace_stop"() : () -> ()
    %92 = arith.addf %59, %91 : vector<10x32xf32>
    %c0_41 = arith.constant 0 : index
    %c0_42 = arith.constant 0 : index
    %93 = vector.load %arg16[%c0_41, %c0_42] : memref<10x32xf32, #tpu.memory_space<vmem>>, vector<10x32xf32>
    tpu.vector_store %arg16[%c0_41, %c0_42], %92 {strides = array<i32>} : memref<10x32xf32, #tpu.memory_space<vmem>>, vector<10x32xf32>,
    %c1_i32 = arith.constant 1 : i32
    %94 = arith.cmpi eq, %arg1, %c1_i32 : i32
    %95 = arith.extui %94 : i1 to i32
    %c0_i32_43 = arith.constant 0 : i32
    %96 = arith.cmpi ne, %95, %c0_i32_43 : i32
    scf.if %96 {
      %97 = vector.shape_cast %92 : vector<10x32xf32> to vector<2x5x32xf32>
      %98 = vector.extract_strided_slice %97 {offsets = [0, 0, 0], sizes = [2, 1, 32], strides = [1, 1, 1]} : vector<2x5x32xf32> to vector<2x1x32xf32>
      %99 = vector.shape_cast %98 : vector<2x1x32xf32> to vector<2x32xf32>
      %c0_44 = arith.constant 0 : index
      %c0_45 = arith.constant 0 : index
      %100 = vector.load %arg12[%c0_44, %c0_45] : memref<1x32xf32, #tpu.memory_space<vmem>>, vector<1x32xf32>
      %cst_46 = arith.constant dense<0.000000e+00> : vector<2xf32>
      %101 = vector.multi_reduction <add>, %99, %cst_46 [1] : vector<2x32xf32> to vector<2xf32>
      %102 = vector.shape_cast %101 : vector<2xf32> to vector<2x1xf32>
      %cst_47 = arith.constant 3.200000e+01 : f32
      %103 = vector.broadcast %cst_47 : f32 to vector<2x1xf32>
      %104 = arith.divf %102, %103 : vector<2x1xf32>
      %105 = vector.broadcast %104 : vector<2x1xf32> to vector<2x32xf32>
      %106 = arith.subf %99, %105 : vector<2x32xf32>
      %107 = arith.mulf %106, %106 : vector<2x32xf32>
      %cst_48 = arith.constant dense<0.000000e+00> : vector<2xf32>
      %108 = vector.multi_reduction <add>, %107, %cst_48 [1] : vector<2x32xf32> to vector<2xf32>
      %109 = vector.shape_cast %108 : vector<2xf32> to vector<2x1xf32>
      %cst_49 = arith.constant 3.200000e+01 : f32
      %110 = vector.broadcast %cst_49 : f32 to vector<2x1xf32>
      %111 = arith.divf %109, %110 : vector<2x1xf32>
      %112 = vector.broadcast %104 : vector<2x1xf32> to vector<2x32xf32>
      %113 = arith.subf %99, %112 : vector<2x32xf32>
      %cst_50 = arith.constant 9.99999974E-6 : f32
      %114 = vector.broadcast %cst_50 : f32 to vector<2x1xf32>
      %115 = arith.addf %111, %114 : vector<2x1xf32>
      %116 = math.rsqrt %115 : vector<2x1xf32>
      %117 = vector.broadcast %116 : vector<2x1xf32> to vector<2x32xf32>
      %118 = arith.mulf %113, %117 : vector<2x32xf32>
      %119 = vector.broadcast %100 : vector<1x32xf32> to vector<2x32xf32>
      %120 = arith.mulf %118, %119 : vector<2x32xf32>
      %121 = arith.truncf %120 : vector<2x32xf32> to vector<2x32xbf16>
      %c0_51 = arith.constant 0 : index
      %c0_52 = arith.constant 0 : index
      %122 = vector.load %arg13[%c0_51, %c0_52] : memref<128x32xbf16, #tpu.memory_space<vmem>>, vector<128x32xbf16>
      "tpu.trace_start"() <{level = 10 : i32, message = "be,ae->ba"}> : () -> ()
      %cst_53 = arith.constant dense<0.000000e+00> : vector<2x128xf32>
      %123 = tpu.matmul %121, %122, %cst_53 {dimension_numbers = #tpu.dot_dimension_numbers<[1], [1], [0], [0], [0, 0, 1, 0], [], []>} : vector<2x32xbf16>, vector<128x32xbf16>, vector<2x128xf32> -> vector<2x128xf32>
      "tpu.trace_stop"() : () -> ()
      %c0_54 = arith.constant 0 : index
      %c0_55 = arith.constant 0 : index
      %124 = vector.load %arg14[%c0_54, %c0_55] : memref<1x128xf32, #tpu.memory_space<vmem>>, vector<1x128xf32>
      %125 = vector.broadcast %124 : vector<1x128xf32> to vector<2x128xf32>
      %126 = arith.addf %123, %125 : vector<2x128xf32>
      %c0_56 = arith.constant 0 : index
      %c0_57 = arith.constant 0 : index
      %c0_58 = arith.constant 0 : index
      %127 = vector.load %arg15[%c0_56, %c0_57, %c0_58] : memref<1x2x128xf32, #tpu.memory_space<vmem>>, vector<1x2x128xf32>
      %128 = vector.shape_cast %127 : vector<1x2x128xf32> to vector<2x128xf32>
      %129 = vector.shape_cast %126 : vector<2x128xf32> to vector<1x2x128xf32>
      tpu.vector_store %arg15[%c0_56, %c0_57, %c0_58], %129 {strides = array<i32>} : memref<1x2x128xf32, #tpu.memory_space<vmem>>, vector<1x2x128xf32>,
    } else {
    }
    return
  }
  func.func @transform_0(%arg0: i32, %arg1: i32) -> (i32, i32, i32) {
    %c0_i32 = arith.constant 0 : i32
    %c0_i32_0 = arith.constant 0 : i32
    %c0_i32_1 = arith.constant 0 : i32
    return %arg0, %c0_i32, %c0_i32_0 : i32, i32, i32
  }
  func.func @transform_1(%arg0: i32, %arg1: i32) -> (i32, i32) {
    %c0_i32 = arith.constant 0 : i32
    %c0_i32_0 = arith.constant 0 : i32
    %c0_i32_1 = arith.constant 0 : i32
    return %c0_i32, %c0_i32_0 : i32, i32
  }
  func.func @transform_2(%arg0: i32, %arg1: i32) -> (i32, i32) {
    %c0_i32 = arith.constant 0 : i32
    %c0_i32_0 = arith.constant 0 : i32
    %c0_i32_1 = arith.constant 0 : i32
    return %c0_i32, %c0_i32_0 : i32, i32
  }
  func.func @transform_3(%arg0: i32, %arg1: i32) -> (i32, i32) {
    %c0_i32 = arith.constant 0 : i32
    %c0_i32_0 = arith.constant 0 : i32
    %c0_i32_1 = arith.constant 0 : i32
    return %c0_i32, %c0_i32_0 : i32, i32
  }
  func.func @transform_4(%arg0: i32, %arg1: i32) -> (i32, i32, i32) {
    %c0_i32 = arith.constant 0 : i32
    %c0_i32_0 = arith.constant 0 : i32
    %c0_i32_1 = arith.constant 0 : i32
    return %arg1, %c0_i32, %c0_i32_0 : i32, i32, i32
  }
  func.func @transform_5(%arg0: i32, %arg1: i32) -> (i32, i32, i32, i32) {
    %c0_i32 = arith.constant 0 : i32
    %c0_i32_0 = arith.constant 0 : i32
    %c0_i32_1 = arith.constant 0 : i32
    %c0_i32_2 = arith.constant 0 : i32
    return %arg1, %c0_i32, %c0_i32_0, %c0_i32_1 : i32, i32, i32, i32
  }
  func.func @transform_6(%arg0: i32, %arg1: i32) -> (i32, i32, i32) {
    %c0_i32 = arith.constant 0 : i32
    %c0_i32_0 = arith.constant 0 : i32
    %c0_i32_1 = arith.constant 0 : i32
    return %arg1, %c0_i32, %c0_i32_0 : i32, i32, i32
  }
  func.func @transform_7(%arg0: i32, %arg1: i32) -> (i32, i32, i32) {
    %c0_i32 = arith.constant 0 : i32
    %c0_i32_0 = arith.constant 0 : i32
    %c0_i32_1 = arith.constant 0 : i32
    return %arg1, %c0_i32, %c0_i32_0 : i32, i32, i32
  }
  func.func @transform_8(%arg0: i32, %arg1: i32) -> (i32, i32, i32) {
    %c0_i32 = arith.constant 0 : i32
    %c0_i32_0 = arith.constant 0 : i32
    %c0_i32_1 = arith.constant 0 : i32
    return %arg1, %c0_i32, %c0_i32_0 : i32, i32, i32
  }
  func.func @transform_9(%arg0: i32, %arg1: i32) -> (i32, i32, i32) {
    %c0_i32 = arith.constant 0 : i32
    %c0_i32_0 = arith.constant 0 : i32
    %c0_i32_1 = arith.constant 0 : i32
    return %arg1, %c0_i32, %c0_i32_0 : i32, i32, i32
  }
  func.func @transform_10(%arg0: i32, %arg1: i32) -> (i32, i32) {
    %c0_i32 = arith.constant 0 : i32
    %c0_i32_0 = arith.constant 0 : i32
    %c0_i32_1 = arith.constant 0 : i32
    return %c0_i32, %c0_i32_0 : i32, i32
  }
  func.func @transform_11(%arg0: i32, %arg1: i32) -> (i32, i32) {
    %c0_i32 = arith.constant 0 : i32
    %c0_i32_0 = arith.constant 0 : i32
    %c0_i32_1 = arith.constant 0 : i32
    return %c0_i32, %c0_i32_0 : i32, i32
  }
  func.func @transform_12(%arg0: i32, %arg1: i32) -> (i32, i32) {
    %c0_i32 = arith.constant 0 : i32
    %c0_i32_0 = arith.constant 0 : i32
    %c0_i32_1 = arith.constant 0 : i32
    return %c0_i32, %c0_i32_0 : i32, i32
  }
  func.func @transform_13(%arg0: i32, %arg1: i32) -> (i32, i32, i32) {
    %c0_i32 = arith.constant 0 : i32
    %c0_i32_0 = arith.constant 0 : i32
    %c0_i32_1 = arith.constant 0 : i32
    return %arg0, %c0_i32, %c0_i32_0 : i32, i32, i32
  }
}

</mosaic_0001>

<bundles_post_ra>
// kernel: tpu_custom_call.1
= control target key start
LH: loop header
LB: loop body
LE: loop exit
PB: predicated region body
PF: predicated region fallthrough
CT: control target
= control target key end

     0   :  { %s3132_s0 = inlined_call_operand.vmem [shape: bf16[2,10,256], index: 0, kind: input, shape index: {}]   ;;  %s3133_s1 = inlined_call_operand.vmem [shape: bf16[32,256], index: 1, kind: input, shape index: {}]   ;;  %s3134_s2 = inlined_call_operand.vmem [shape: f32[10,32], index: 2, kind: input, shape index: {}]   ;;  %s3135_s3 = inlined_call_operand.vmem [shape: f32[10,10], index: 3, kind: input, shape index: {}]   ;;  %s3136_s4 = inlined_call_operand.vmem [shape: f32[2,1,32], index: 4, kind: input, shape index: {}]   ;;  %s3137_s5 = inlined_call_operand.vmem [shape: bf16[2,12,8,32], index: 5, kind: input, shape index: {}]   ;;  %s3138_s6 = inlined_call_operand.vmem [shape: bf16[2,32,32], index: 6, kind: input, shape index: {}]   ;;  %s3139_s7 = inlined_call_operand.vmem [shape: f32[2,1,32], index: 7, kind: input, shape index: {}]   ;;  %s3140_s8 = inlined_call_operand.vmem [shape: bf16[2,128,32], index: 8, kind: input, shape index: {}]   ;;  %s3141_s9 = inlined_call_operand.vmem [shape: bf16[2,32,128], index: 9, kind: input, shape index: {}]   ;;  %s3142_s10 = inlined_call_operand.vmem [shape: f32[1,32], index: 10, kind: input, shape index: {}]   ;;  %s3143_s11 = inlined_call_operand.vmem [shape: bf16[128,32], index: 11, kind: input, shape index: {}]   ;;  %s3144_s12 = inlined_call_operand.vmem [shape: f32[1,128], index: 12, kind: input, shape index: {}]   ;;  %s3145_s13 = inlined_call_operand.hbm [shape: f32[2,2,128], index: 13, kind: output, shape index: {}]  }
   0x1   :  { %3160 = sst [smem:[#allocation18_spill]] %s3132_s0 }
   0x2   :  { %3161 = sst [smem:[#allocation19_spill]] %s3142_s10 }
   0x3   :  { %3162 = sst [smem:[#allocation20_spill]] %s3144_s12 }
   0x4   :  { %3163 = sst [smem:[#allocation21_spill]] %s3145_s13 }
   0x5   :  { %18 = vsyncpa [#allocation4], 0 }
   0x6   :  { %20 = vsyncpa [#allocation4 + $0x1], 0  ;;  %s2628_s25 = smov 0   ;;  %s2630_s26 = smov 0  }
   0x7   :  { %s2632_s27 = smov 0   ;;  %s2634_s28 = smov 0  }
   0x8   :  { %s2636_s29 = smov 0   ;;  %s2638_s30 = smov 0  }
   0x9   :  { %s2640_s14 = smov 0   ;;  %s2642_s15 = smov 0  }
   0xa LB: > { %3164 = sst [smem:[#allocation6_spill]] %s2522_s25  ;;  %s2085_s16 = sadd.s32 4294967295, %s2550_s15   ;;  %s2550_s15 = sphi %s2642_s15, %s26_s15   ;;  %s2546_s14 = sphi %s2640_s14, %s3203_s14   ;;  %s2542_s30 = sphi %s2638_s30, %s3202_s30   ;;  %s2538_s29 = sphi %s2636_s29, %s3201_s29   ;;  %s2534_s28 = sphi %s2634_s28, %s3200_s28   ;;  %s2530_s27 = sphi %s2632_s27, %s3199_s27   ;;  %s2526_s26 = sphi %s2630_s26, %s3198_s26   ;;  %s2522_s25 = sphi %s2628_s25, %s3197_s25  }
   0xb   : > { %3165 = sst [smem:[#allocation7_spill]] %s2526_s26  ;;  %s2086_s17 = sadd.s32 4294967294, %s2550_s15  }
   0xc   : > { %3166 = sst [smem:[#allocation8_spill]] %s2530_s27  ;;  %s35_s18 = sadd.s32 1, %s2542_s30 }
   0xd   : > { %3167 = sst [smem:[#allocation9_spill]] %s2538_s29  ;;  %p36_p0 = scmp.ge.s32.totalorder %s35_s18, 2 }
   0xe   : > { %3168 = sst [smem:[#allocation10_spill]] %s2542_s30  ;;  %s38_s19 = sadd.s32 1, %s2546_s14 }
   0xf   : > { %3169 = sst [smem:[#allocation11_spill]] %s2546_s14  ;;  %p363_p1 = scmp.ne.s32.totalorder %s2530_s27, %s2526_s26 }
  0x10   : > { %3170 = sst [smem:[#allocation12_spill]] %s2550_s15  ;;  %p364_p2 = scmp.eq.s32.totalorder %s2085_s16, 3 }
  0x11   : > { %s3205_s18 = smov (%p36_p0, %s35_s18), 0  ;;  %s3207_s19 = smov (!%p36_p0, %s38_s19), %s2546_s14 }
  0x12   : > { %3171 = sst [smem:[#allocation13_spill]] %s3205_s18  ;;  %p2677_p3 = por %p364_p2, %p363_p1 }
  0x13   : > { %p369_p4 = scmp.ne.s32.totalorder %s2526_s26, %s2522_s25  ;;  %p40_p5 = scmp.ge.s32.totalorder %s3207_s19, 2 }
  0x14   : > { %s3172_s20 = scalar_select %p2677_p3, 1, 0 }
  0x15   : > { %p370_p6 = scmp.eq.s32.totalorder %s2086_s17, 3  ;;  %p2089_p7 = scmp.ge.s32.totalorder %s2550_s15, 1 }
  0x16   : > { %3173 = sst [smem:[#allocation14_spill]] %s3172_s20  ;;  %p458_p8 = scmp.lt.s32.totalorder %s2550_s15, 5 }
  0x17   : > { %s3209_s19 = smov (%p40_p5, %s3207_s19), 0  ;;  %p2687_p9 = por %p370_p6, %p369_p4 }
  0x18   : > { %3174 = sst [smem:[#allocation15_spill]] %s3209_s19  ;;  %p459_p10 = pnand %p2089_p7, %p458_p8 }
  0x19   : > { %s3175_s21 = scalar_select %p2687_p9, 1, 0 }
  0x1a   : > { %s350_s22 = ssub.s32 %s2546_s14, %s3209_s19  ;;  %s353_s23 = sadd.s32 1, %s2530_s27 }
  0x1b   : > { %3176 = sst [smem:[#allocation16_spill]] %s3175_s21  ;;  %p351_p11 = scmp.eq.s32.totalorder %s350_s22, 0 }
  0x1c   : > { %462 = sbr.rel (%p459_p10) target bundleno = 2666 (0xa6a), region = 72  ;;  %s3150_s16 = sand.u32 (!%p459_p10), 1, %s2526_s26  }
  0x1d   : > { %s2695_s24 = scalar_select %p351_p11, %s2530_s27, %s353_s23  }
  0x1e   : > { %p528_p12 = scmp.lt.s32.totalorder (!%p459_p10), %s2538_s29, 1  ;;  %s2701_s17 = sshll.u32 (!%p459_p10), %s3150_s16, 1 }
  0x1f   : > { %3177 = sst [smem:[#allocation17_spill]] %s2695_s24  ;;  %p533_p13 = scmp.lt.s32.totalorder (!%p459_p10), %s2534_s28, 1 }
  0x20   : > { %s3178_s0 = sld [smem:[#allocation18_spill]] (!%p459_p10)  ;;  %s527_s15 = scalar_lea.vmem (!%p459_p10), [#allocation3], %s2701_s17 }
  0x21   : > { %s529_s18 = scalar_select %p528_p12, %s2538_s29, 1 }
  0x22   : > { %s2706_s19 = scalar_select %p533_p13, %s2534_s28, 1 }
  0x23   : > { %s2251_s22 = sshll.u32 %s529_s18, 4  ;;  %p2100_p0 = scmp.ne.s32.totalorder %s2534_s28, 0 }
  0x24   : > { %s2288_s21 = smul.u32 48, %s2706_s19  ;;  %s2252_s25 = sshll.u32 %s2706_s19, 4 }
  0x25   : > { %s2722_s20 = scalar_lea.vmem %s3138_s6, %s2252_s25  ;;  %s548_s18 = scalar_lea.vmem %s3139_s7, %s2706_s19 }
  0x26   : > { %s2711_s30 = scalar_lea.vmem %s3178_s0, %s2251_s22  ;;  %s2731_s14 = scalar_lea.vmem %s3137_s5, %s2288_s21 }
  0x27   : > { %s2253_s22 = sshll.u32 %s2706_s19, 6  ;;  %s2742_s13 = scalar_lea.vmem %s3141_s9, %s2252_s25 }
  0x28   : > { %s2737_s24 = scalar_lea.vmem %s3140_s8, %s2253_s22  ;;  %563 = sbr.rel (%p2100_p0) target bundleno = 202 (0xca), region = 76 }
  0x2d   : > { %v2119_v0 = vld [vmem:[%s3133_s1 + $0x10] sm:$0xf]  ;;  %v2260_v1 = vld [vmem:[%s3133_s1 + $0x14] sm:$0xf0]  ;;  %v2259_v2 = vld [vmem:[%s3133_s1 + $0x14] sm:$0xf] }
  0x2e   : > { %v2120_v3 = vor.u32 %v2260_v1, %v2119_v0  ;;  %v2121_v4 = vld [vmem:[%s3133_s1 + $0x18] sm:$0xf0]  ;;  %v2111_v6 = vld [vmem:[%s3133_s1] sm:$0xf]  ;;  %v2258_v7 = vld [vmem:[%s3133_s1 + $0x4] sm:$0xf0] }
  0x2f   : > { %v2124_v5 = vor.u32 %v2259_v2, %v2121_v4  ;;  %v2257_v8 = vld [vmem:[%s3133_s1 + $0x4] sm:$0xf]  ;;  %v2113_v9 = vld [vmem:[%s3133_s1 + $0x8] sm:$0xf0]  ;;  %v2112_v10 = vor.u32 %v2258_v7, %v2111_v6  ;;  %v2103_v12 = vld [vmem:[%s2711_s30] sm:$0xf] }
  0x30   : > { %608 = vmatpush.bf16.xpose.msra.mxu0 %v2120_v3  ;;  %v2116_v11 = vor.u32 %v2257_v8, %v2113_v9  ;;  %v2256_v13 = vld [vmem:[%s2711_s30 + $0x4] sm:$0x10]  ;;  %v2255_v14 = vld [vmem:[%s2711_s30 + $0x4] sm:$0xf]  ;;  %v2105_v15 = vld [vmem:[%s2711_s30 + $0x8] sm:$0x10] }
  0x31   : > { %622 = vmatpush.bf16.xpose.msra.mxu1 %v2124_v5  ;;  %v2104_v16 = vor.u32 %v2256_v13, %v2103_v12  ;;  %v2108_v17 = vor.u32 %v2255_v14, %v2105_v15  ;;  %v570_v18 = vld [vmem:[%s3134_s2] sm:$0xff]  ;;  %vm630_vm0 = vcmask 261120   ;;  %v571_v23 = vld [vmem:[%s3134_s2 + $0x8] sm:$0x3]  ;;  %vm632_vm1 = vcmask 254976  }
  0x38   : > { %609 = vmatpush.bf16.xpose.msra.mxu0 %v2112_v10 }
  0x39   : > { %623 = vmatpush.bf16.xpose.msra.mxu1 %v2116_v11 }
  0x3f   : > { %610 = vmatmul.bf16.vlgmr.msra.gmra.mxu0 %v2104_v16 }
  0x40   : > { %624 = vmatmul.bf16.vlgmr.msra.gmra.mxu1 %v2108_v17 }
  0xbc   : > { %v611_v19 = vpop.f32.mrf.mxu0 }
  0xbd   : > { %v612_v20 = vadd.f32 %v611_v19, %v570_v18  ;;  %v625_v21 = vpop.f32.mrf.mxu1 }
  0xbf   : > { %v626_v22 = vadd.f32 %v625_v21, %v612_v20 }
  0xc1   : > { %631 = vst.msk [vmem:[#allocation2] sm:$0xff] %vm630_vm0, %v626_v22 }
  0xc4   : > { %v613_v24 = vpop.f32.mrf.mxu0 }
  0xc5   : > { %v614_v25 = vadd.f32 %v613_v24, %v571_v23  ;;  %v627_v26 = vpop.f32.mrf.mxu1 }
  0xc7   : > { %v628_v27 = vadd.f32 %v627_v26, %v614_v25 }
  0xc9   : > { %633 = vst.msk [vmem:[#allocation2 + $0x8] sm:$0x3] %vm632_vm1, %v628_v27 }
  0xca PF: > { %v634_v28 = vld [vmem:[#allocation2] sm:$0xff]  ;;  %vm637_vm2 = vcmask 261120   ;;  %vm641_vm3 = vcmask 254976   ;;  %v2552_v32 = vmov 32.0   ;;  %s3179_s27 = scalar_lea.vmem %s3136_s4, %s2706_s19  ;;  %v2261_v12 = vld [vmem:[%s2731_s14] sm:$0xff]  ;;  %v2263_v14 = vld [vmem:[%s2731_s14 + $0x10] sm:$0xff] }
  0xcb   : > { %v638_v29 = vsel %vm637_vm2, %v634_v28, 0.0  ;;  %2408 = vrcp.f32 %v2552_v32  ;;  %v2406_v5 = vld [vmem:[%s3179_s27] ss:$0 sm:$0xff]  ;;  %v2262_v13 = vld [vmem:[%s2731_s14 + $0x8] sm:$0xff]  ;;  %v2264_v18 = vld [vmem:[%s2731_s14 + $0x18] sm:$0xff]  ;;  %vm953_vm11 = vcmask 1043456  }
  0xcc   : > { %639 = vadd.xlane.f32.xlu0 %v638_v29  ;;  %v2266_v24 = vld [vmem:[%s2731_s14 + $0x28] sm:$0xff]  ;;  %v2265_v27 = vld [vmem:[%s2731_s14 + $0x20] sm:$0xff]  ;;  %vm949_vm12 = vcmask 64512   ;;  %vm1046_vm13 = vcmask 80896   ;;  %vm1050_vm14 = vcmask 74752   ;;  %s2555_s12 = smov 16  }
  0xcd   : > { %s2556_s21 = smov 8   ;;  %s2557_s22 = smov 24  }
  0xce   : > { %p2213_p1 = scmp.ne.s32.totalorder %s2534_s28, 1 }
  0xd0   : > { %v635_v30 = vld [vmem:[#allocation2 + $0x8] sm:$0x3] }
  0xd1   : > { %v642_v31 = vsel %vm641_vm3, %v635_v30, 0.0  ;;  %v2409_v33 = vpop.eup %2408 }
  0xd2   : > { %v646_v34 = vmul.f32 32.0, %v2409_v33  ;;  %vm650_vm4 = vweird.f32 %v2409_v33 }
  0xd4   : > { %643 = vadd.xlane.f32.xlu0 %v642_v31  ;;  %v647_v35 = vsub.f32 1.0, %v646_v34 }
  0xd6   : > { %v648_v36 = vmul.f32 %v2409_v33, %v647_v35 }
  0xd8   : > { %v649_v37 = vadd.f32 %v2409_v33, %v648_v36 }
  0xda   : > { %v2782_v38 = vsel %vm650_vm4, %v2409_v33, %v649_v37 }
 0x13f   : > { %v640_v39 = vpop.xlane.xlu0 %639 }
 0x140   : > { %v652_v40 = vmul.f32 %v2782_v38, %v640_v39 }
 0x142   : > { %v654_v41 = vsub.f32 %v634_v28, %v652_v40 }
 0x144   : > { %v656_v42 = vmul.f32 %v654_v41, %v654_v41 }
 0x146   : > { %v658_v43 = vsel %vm637_vm2, %v656_v42, 0.0 }
 0x147   : > { %659 = vadd.xlane.f32.xlu1 %v658_v43  ;;  %v644_v44 = vpop.xlane.xlu0 %643 }
 0x148   : > { %v653_v45 = vmul.f32 %v2782_v38, %v644_v44 }
 0x14a   : > { %v655_v46 = vsub.f32 %v635_v30, %v653_v45 }
 0x14c   : > { %v657_v47 = vmul.f32 %v655_v46, %v655_v46 }
 0x14e   : > { %v661_v48 = vsel %vm641_vm3, %v657_v47, 0.0 }
 0x14f   : > { %662 = vadd.xlane.f32.xlu1 %v661_v48 }
 0x1ba   : > { %v660_v49 = vpop.xlane.xlu1 %659 }
 0x1bb   : > { %v664_v50 = vmul.f32 %v660_v49, %v2782_v38 }
 0x1bd   : > { %v666_v51 = vadd.f32 1e-05, %v664_v50 }
 0x1bf   : > { %2410 = vrsqrt.f32 %v666_v51  ;;  %vm674_vm6 = vweird.f32 %v666_v51 }
 0x1c2   : > { %v663_v52 = vpop.xlane.xlu1 %662 }
 0x1c3   : > { %v665_v53 = vmul.f32 %v663_v52, %v2782_v38 }
 0x1c5   : > { %v2411_v54 = vpop.eup %2410  ;;  %v667_v55 = vadd.f32 1e-05, %v665_v53 }
 0x1c6   : > { %v669_v56 = vmul.f32 %v2411_v54, %v666_v51  ;;  %vm675_vm5 = vweird.f32 %v2411_v54 }
 0x1c7   : > { %2412 = vrsqrt.f32 %v667_v55  ;;  %vm676_vm7 = vmor %vm674_vm6, %vm675_vm5  ;;  %vm684_vm9 = vweird.f32 %v667_v55 }
 0x1c8   : > { %v670_v57 = vmul.f32 %v2411_v54, %v669_v56 }
 0x1ca   : > { %v671_v58 = vmul.f32 0.5, %v670_v57 }
 0x1cc   : > { %v672_v59 = vsub.f32 1.5, %v671_v58 }
 0x1cd   : > { %v2413_v60 = vpop.eup %2412 }
 0x1ce   : > { %v679_v61 = vmul.f32 %v2413_v60, %v667_v55  ;;  %v673_v62 = vmul.f32 %v2411_v54, %v672_v59  ;;  %vm685_vm8 = vweird.f32 %v2413_v60 }
 0x1cf   : > { %vm686_vm10 = vmor %vm684_vm9, %vm685_vm8 }
 0x1d0   : > { %v680_v63 = vmul.f32 %v2413_v60, %v679_v61  ;;  %v677_v2 = vsel %vm676_vm7, %v2411_v54, %v673_v62 }
 0x1d1   : > { %v688_v4 = vmul.f32 %v677_v2, %v654_v41 }
 0x1d2   : > { %v681_v0 = vmul.f32 0.5, %v680_v63 }
 0x1d3   : > { %v693_v8 = vmul.f32 %v2406_v5, %v688_v4 }
 0x1d4   : > { %v682_v1 = vsub.f32 1.5, %v681_v0 }
 0x1d6   : > { %v683_v3 = vmul.f32 %v2413_v60, %v682_v1 }
 0x1d8   : > { %v687_v6 = vsel %vm686_vm10, %v2413_v60, %v683_v3 }
 0x1d9   : > { %v689_v7 = vmul.f32 %v687_v6, %v655_v46 }
 0x1db   : > { %v694_v9 = vmul.f32 %v2406_v5, %v689_v7 }
 0x1dd   : > { %v695_v10 = vpack.c.bf16 %v694_v9, %v693_v8 }
 0x1df   : > { %v757_v11 = vsel %vm637_vm2, %v695_v10, 0 }
 0x1e0   : > { %766 = vmatpush.bf16.xpose.msra.mxu0 %v757_v11  ;;  %2287 = vmatpush.bf16.xpose.msra.mxu2 %v757_v11 }
 0x1e7   : > { %2149 = vmatmul.msk.bf16.vlgmr.msra.gmra.mxu0 %vm637_vm2, %v2261_v12  ;;  %2154 = vmatmul.msk.bf16.vlgmr.msra.gmra.mxu2 %vm637_vm2, %v2266_v24 }
 0x1f7   : > { %2150 = vmatmul.msk.bf16.gmra.mxu0 %vm637_vm2, %v2262_v13 }
 0x207   : > { %2151 = vmatmul.msk.bf16.gmra.mxu0 %vm637_vm2, %v2263_v14 }
 0x217   : > { %2152 = vmatmul.msk.bf16.gmra.mxu0 %vm637_vm2, %v2264_v18 }
 0x227   : > { %2153 = vmatmul.msk.bf16.gmra.mxu0 %vm637_vm2, %v2265_v27 }
 0x264   : > { %v768_v15 = vpop.f32.mrf.mxu0 }
 0x26a   : > { %v793_v7 = vpop.f32.mrf.mxu2 }
 0x26b   : > { %v940_v9 = vpack.c.bf16 %v793_v7, %v793_v7 }
 0x26c   : > { %v770_v16 = vpop.f32.mrf.mxu0 }
 0x26d   : > { %v2367_v17 = vpack.i.bf16 %v770_v16, %v768_v15  ;;  %v1307_v13 = vsel %vm1046_vm13, %v940_v9, 0 }
 0x26f   : > { %2368 = vxpose.xlu2.b32.start.end [1/1] (short) (narrow) %v2367_v17, 16  ;;  %v942_v17 = vld [vmem:[%s3135_s3] sm:$0xff] }
 0x272   : > { %v795_v12 = vpop.f32.mrf.mxu2 }
 0x273   : > { %v941_v14 = vpack.c.bf16 %v795_v12, %v795_v12 }
 0x274   : > { %v773_v19 = vpop.f32.mrf.mxu0 }
 0x275   : > { %v1332_v16 = vsel %vm1046_vm13, %v941_v14, 0 }
 0x27c   : > { %v775_v20 = vpop.f32.mrf.mxu0 }
 0x27d   : > { %v2379_v21 = vpack.i.bf16 %v775_v20, %v773_v19 }
 0x27f   : > { %2380 = vxpose.xlu2.b32.start.end [1/1] (short) (narrow) %v2379_v21, 16 }
 0x284   : > { %v778_v22 = vpop.f32.mrf.mxu0 }
 0x285   : > { %v934_v25 = vpack.c.bf16 %v778_v22, %v778_v22  ;;  %v943_v22 = vld [vmem:[%s3135_s3 + $0x8] sm:$0x3] }
 0x287   : > { %v955_v28 = vsel %vm953_vm11, %v934_v25, 0 }
 0x288   : > { %964 = vmatpush.bf16.msra.mxu3 %v955_v28 }
 0x28c   : > { %v780_v23 = vpop.f32.mrf.mxu0 }
 0x28d   : > { %v935_v26 = vpack.c.bf16 %v780_v23, %v780_v23 }
 0x28f   : > { %v980_v29 = vsel %vm953_vm11, %v935_v26, 0 }
 0x290   : > { %989 = vmatpush.bf16.msrb.mxu2 %v980_v29 }
 0x294   : > { %v783_v30 = vpop.f32.mrf.mxu0 }
 0x295   : > { %v936_v32 = vpack.c.bf16 %v783_v30, %v783_v30 }
 0x297   : > { %v1005_v34 = vsel %vm953_vm11, %v936_v32, 0 }
 0x298   : > { %1014 = vmatpush.bf16.msrb.mxu3 %v1005_v34 }
 0x29c   : > { %v785_v31 = vpop.f32.mrf.mxu0 }
 0x29d   : > { %v937_v33 = vpack.c.bf16 %v785_v31, %v785_v31 }
 0x29f   : > { %v1030_v35 = vsel %vm953_vm11, %v937_v33, 0 }
 0x2a0   : > { %1039 = vmatpush.bf16.msra.mxu1 %v1030_v35 }
 0x2a4   : > { %v788_v5 = vpop.f32.mrf.mxu0 }
 0x2a5   : > { %v938_v6 = vpack.c.bf16 %v788_v5, %v788_v5 }
 0x2a7   : > { %v1257_v8 = vsel %vm1046_vm13, %v938_v6, 0 }
 0x2a8   : > { %1266 = vmatpush.bf16.xpose.msra.mxu2 %v1257_v8 }
 0x2ac   : > { %v790_v10 = vpop.f32.mrf.mxu0 }
 0x2ad   : > { %v939_v11 = vpack.c.bf16 %v790_v10, %v790_v10 }
 0x2af   : > { %v1282_v15 = vsel %vm1046_vm13, %v939_v11, 0 }
 0x308   : > { %v2369_v36 = vpop.trf.xlu2 }
 0x309   : > { %v2373_v37 = vunpack.i.h.bf16 %v2369_v36  ;;  %v2370_v39 = vunpack.i.l.bf16 %v2369_v36 }
 0x30b   : > { %v928_v40 = vpack.c.bf16 %v2373_v37, %v2373_v37  ;;  %v926_v41 = vpack.c.bf16 %v2370_v39, %v2370_v39 }
 0x30d   : > { %v973_v47 = vunpack.c.l.b16 %v928_v40  ;;  %v946_v49 = vunpack.c.l.b16 %v926_v41 }
 0x310   : > { %v2374_v42 = vpop.trf.xlu2 }
 0x311   : > { %v2378_v43 = vunpack.i.h.bf16 %v2374_v42  ;;  %v2375_v44 = vunpack.i.l.bf16 %v2374_v42 }
 0x313   : > { %v929_v45 = vpack.c.bf16 %v2378_v43, %v2378_v43  ;;  %v927_v46 = vpack.c.bf16 %v2375_v44, %v2375_v44 }
 0x315   : > { %v974_v48 = vunpack.c.l.b16 %v929_v45  ;;  %v947_v50 = vunpack.c.l.b16 %v927_v46 }
 0x317   : > { %v948_v51 = vpack.c.b16 %v947_v50, %v946_v49  ;;  %v975_v52 = vpack.c.b16 %v974_v48, %v973_v47 }
 0x318   : > { %v2381_v53 = vpop.trf.xlu2 }
 0x319   : > { %2155 = vmatmul.msk.bf16.vlgmr.msra.gmra.mxu3 %vm949_vm12, %v948_v51  ;;  %2156 = vmatmul.msk.bf16.vlgmr.msrb.gmra.mxu2 %vm949_vm12, %v975_v52  ;;  %v2385_v54 = vunpack.i.h.bf16 %v2381_v53  ;;  %v2382_v55 = vunpack.i.l.bf16 %v2381_v53 }
 0x31a   : > { %1291 = vmatpush.bf16.xpose.msra.mxu3 %v1282_v15  ;;  %1341 = vmatpush.bf16.xpose.msrb.mxu2 %v1332_v16 }
 0x31b   : > { %v932_v56 = vpack.c.bf16 %v2385_v54, %v2385_v54  ;;  %v930_v57 = vpack.c.bf16 %v2382_v55, %v2382_v55 }
 0x31d   : > { %v998_v63 = vunpack.c.l.b16 %v930_v57  ;;  %v1023_v1 = vunpack.c.l.b16 %v932_v56 }
 0x320   : > { %v2386_v58 = vpop.trf.xlu2 }
 0x321   : > { %v2390_v59 = vunpack.i.h.bf16 %v2386_v58  ;;  %v2387_v60 = vunpack.i.l.bf16 %v2386_v58 }
 0x323   : > { %v933_v61 = vpack.c.bf16 %v2390_v59, %v2390_v59  ;;  %v931_v62 = vpack.c.bf16 %v2387_v60, %v2387_v60 }
 0x325   : > { %v999_v0 = vunpack.c.l.b16 %v931_v62  ;;  %v1024_v2 = vunpack.c.l.b16 %v933_v61 }
 0x327   : > { %v1000_v3 = vpack.c.b16 %v999_v0, %v998_v63  ;;  %v1025_v4 = vpack.c.b16 %v1024_v2, %v1023_v1 }
 0x329   : > { %2157 = vmatmul.msk.bf16.vlgmr.msrb.gmra.mxu3 %vm949_vm12, %v1000_v3  ;;  %2158 = vmatmul.msk.bf16.vlgmr.msra.gmra.mxu1 %vm949_vm12, %v1025_v4 }
 0x32a   : > { %1316 = vmatpush.bf16.xpose.msrb.mxu3 %v1307_v13 }
 0x39c   : > { %v966_v18 = vpop.f32.mrf.mxu3  ;;  %v991_v20 = vpop.f32.mrf.mxu2 }
 0x39d   : > { %v967_v19 = vadd.f32 %v966_v18, %v942_v17  ;;  %v992_v23 = vadd.f32 %v991_v20, %v942_v17 }
 0x39f   : > { %v1047_v21 = vsel %vm1046_vm13, %v967_v19, -inf  ;;  %v1054_v29 = vsel %vm1046_vm13, %v992_v23, -inf }
 0x3a0   : > { %1048 = vmax.xlane.f32.xlu0 %v1047_v21 }
 0x3a4   : > { %v968_v24 = vpop.f32.mrf.mxu3  ;;  %v993_v30 = vpop.f32.mrf.mxu2 }
 0x3a5   : > { %v969_v25 = vadd.f32 %v968_v24, %v943_v22  ;;  %v994_v32 = vadd.f32 %v993_v30, %v943_v22 }
 0x3a6   : > { %v1041_v26 = vpop.f32.mrf.mxu1 }
 0x3a7   : > { %v1042_v27 = vadd.f32 %v1041_v26, %v942_v17  ;;  %v1051_v28 = vsel %vm1050_vm14, %v969_v25, -inf  ;;  %v1057_v36 = vsel %vm1050_vm14, %v994_v32, -inf }
 0x3a8   : > { %1052 = vmax.xlane.f32.xlu1 %v1051_v28  ;;  %1055 = vmax.xlane.f32.xlu0 %v1054_v29 }
 0x3a9   : > { %v1066_v31 = vsel %vm1046_vm13, %v1042_v27, -inf }
 0x3aa   : > { %1067 = vmax.xlane.f32.xlu2 %v1066_v31 }
 0x3ac   : > { %v1016_v33 = vpop.f32.mrf.mxu3 }
 0x3ad   : > { %v1017_v39 = vadd.f32 %v1016_v33, %v942_v17 }
 0x3ae   : > { %v1043_v34 = vpop.f32.mrf.mxu1 }
 0x3af   : > { %v1044_v35 = vadd.f32 %v1043_v34, %v943_v22  ;;  %v1060_v42 = vsel %vm1046_vm13, %v1017_v39, -inf }
 0x3b0   : > { %1058 = vmax.xlane.f32.xlu1 %v1057_v36 }
 0x3b1   : > { %v1069_v37 = vsel %vm1050_vm14, %v1044_v35, -inf }
 0x3b2   : > { %1070 = vmax.xlane.f32.xlu0 %v1069_v37 }
 0x3b4   : > { %v1018_v40 = vpop.f32.mrf.mxu3 }
 0x3b5   : > { %v1019_v41 = vadd.f32 %v1018_v40, %v943_v22 }
 0x3b7   : > { %v1063_v43 = vsel %vm1050_vm14, %v1019_v41, -inf }
 0x3b8   : > { %1061 = vmax.xlane.f32.xlu1 %v1060_v42 }
 0x3ba   : > { %1064 = vmax.xlane.f32.xlu0 %v1063_v43 }
 0x413   : > { %v1049_v44 = vpop.xlane.xlu0 %1048 }
 0x414   : > { %v1072_v45 = vsub.f32 %v967_v19, %v1049_v44 }
 0x416   : > { %v1080_v46 = vmul.f32 1.442695, %v1072_v45 }
 0x418   : > { %2414 = vpow2.f32 %v1080_v46 }
 0x41b   : > { %v1053_v47 = vpop.xlane.xlu1 %1052  ;;  %v1056_v48 = vpop.xlane.xlu0 %1055 }
 0x41c   : > { %v1073_v49 = vsub.f32 %v969_v25, %v1053_v47  ;;  %v1074_v50 = vsub.f32 %v992_v23, %v1056_v48 }
 0x41d   : > { %v1068_v51 = vpop.xlane.xlu2 %1067 }
 0x41e   : > { %v2830_v52 = vpop.eup %2414  ;;  %v1082_v53 = vmul.f32 1.442695, %v1073_v49  ;;  %v1084_v54 = vmul.f32 1.442695, %v1074_v50  ;;  %v1078_v55 = vsub.f32 %v1042_v27, %v1068_v51 }
 0x41f   : > { %v1096_v56 = vsel %vm1046_vm13, %v2830_v52, 0.0 }
 0x420   : > { %2416 = vpow2.f32 %v1082_v53  ;;  %1097 = vadd.xlane.f32.xlu1 %v1096_v56  ;;  %v1092_v57 = vmul.f32 1.442695, %v1078_v55 }
 0x421   : > { %2418 = vpow2.f32 %v1084_v54 }
 0x422   : > { %2420 = vpow2.f32 %v1092_v57 }
 0x423   : > { %v1059_v58 = vpop.xlane.xlu1 %1058 }
 0x424   : > { %v1075_v59 = vsub.f32 %v994_v32, %v1059_v58 }
 0x425   : > { %v1071_v60 = vpop.xlane.xlu0 %1070 }
 0x426   : > { %v2834_v61 = vpop.eup %2416  ;;  %v1086_v62 = vmul.f32 1.442695, %v1075_v59  ;;  %v1079_v63 = vsub.f32 %v1044_v35, %v1071_v60 }
 0x427   : > { %v2836_v0 = vpop.eup %2418  ;;  %v1099_v1 = vsel %vm1050_vm14, %v2834_v61, 0.0 }
 0x428   : > { %2422 = vpow2.f32 %v1086_v62  ;;  %v1102_v2 = vsel %vm1046_vm13, %v2836_v0, 0.0  ;;  %1100 = vadd.xlane.f32.xlu0 %v1099_v1  ;;  %v1094_v3 = vmul.f32 1.442695, %v1079_v63  ;;  %v2842_v6 = vpop.eup %2420 }
 0x429   : > { %1103 = vadd.xlane.f32.xlu1 %v1102_v2  ;;  %v1114_v12 = vsel %vm1046_vm13, %v2842_v6, 0.0 }
 0x42a   : > { %2424 = vpow2.f32 %v1094_v3 }
 0x42b   : > { %v1062_v4 = vpop.xlane.xlu1 %1061 }
 0x42c   : > { %v1076_v5 = vsub.f32 %v1017_v39, %v1062_v4 }
 0x42d   : > { %v1065_v7 = vpop.xlane.xlu0 %1064 }
 0x42e   : > { %v2844_v8 = vpop.eup %2422  ;;  %v1088_v9 = vmul.f32 1.442695, %v1076_v5  ;;  %v1077_v10 = vsub.f32 %v1019_v41, %v1065_v7 }
 0x42f   : > { %v1105_v11 = vsel %vm1050_vm14, %v2844_v8, 0.0 }
 0x430   : > { %2426 = vpow2.f32 %v1088_v9  ;;  %1106 = vadd.xlane.f32.xlu0 %v1105_v11  ;;  %v1090_v13 = vmul.f32 1.442695, %v1077_v10  ;;  %v2850_v14 = vpop.eup %2424 }
 0x431   : > { %1115 = vadd.xlane.f32.xlu1 %v1114_v12  ;;  %v1117_v16 = vsel %vm1050_vm14, %v2850_v14, 0.0 }
 0x432   : > { %2428 = vpow2.f32 %v1090_v13 }
 0x436   : > { %v2852_v15 = vpop.eup %2426 }
 0x437   : > { %v1108_v17 = vsel %vm1046_vm13, %v2852_v15, 0.0 }
 0x438   : > { %1118 = vadd.xlane.f32.xlu0 %v1117_v16  ;;  %v2858_v18 = vpop.eup %2428 }
 0x439   : > { %1109 = vadd.xlane.f32.xlu1 %v1108_v17  ;;  %v1111_v19 = vsel %vm1050_vm14, %v2858_v18, 0.0 }
 0x440   : > { %1112 = vadd.xlane.f32.xlu0 %v1111_v19 }
 0x493   : > { %v1098_v20 = vpop.xlane.xlu1 %1097 }
 0x494   : > { %2430 = vrcp.f32 %v1098_v20  ;;  %v1131_v32 = vand.u32 2147483648, %v1098_v20  ;;  %vm1125_vm0 = vweird.f32 %v1098_v20  ;;  %v1129_v35 = vand.u32 2147483647, %v1098_v20 }
 0x496   : > { %v1132_v44 = vor.u32 1.1754944e-38, %v1131_v32  ;;  %vm1130_vm6 = vcmp.eq.f32.partialorder %v1129_v35, 8.507059e+37 }
 0x49a   : > { %v2431_v21 = vpop.eup %2430 }
 0x49b   : > { %v1121_v22 = vmul.f32 %v2431_v21, %v1098_v20  ;;  %v1101_v23 = vpop.xlane.xlu0 %1100  ;;  %vm1126_vm15 = vweird.f32 %v2431_v21 }
 0x49c   : > { %v1104_v24 = vpop.xlane.xlu1 %1103  ;;  %2432 = vrcp.f32 %v1101_v23  ;;  %vm2867_vm1 = vmor %vm1125_vm0, %vm1126_vm15  ;;  %v1146_v40 = vand.u32 2147483648, %v1101_v23  ;;  %v1144_v43 = vand.u32 2147483647, %v1101_v23  ;;  %vm1140_vm8 = vweird.f32 %v1101_v23 }
 0x49d   : > { %v1122_v25 = vsub.f32 1.0, %v1121_v22  ;;  %2434 = vrcp.f32 %v1104_v24  ;;  %v1161_v46 = vand.u32 2147483648, %v1104_v24  ;;  %vm1155_vm7 = vweird.f32 %v1104_v24 }
 0x49e   : > { %v1159_v51 = vand.u32 2147483647, %v1104_v24  ;;  %v1147_v53 = vor.u32 1.1754944e-38, %v1146_v40  ;;  %vm1145_vm11 = vcmp.eq.f32.partialorder %v1144_v43, 8.507059e+37 }
 0x49f   : > { %v1123_v26 = vmul.f32 %v2431_v21, %v1122_v25  ;;  %v1162_v60 = vor.u32 1.1754944e-38, %v1161_v46 }
 0x4a0   : > { %vm1160_vm14 = vcmp.eq.f32.partialorder %v1159_v51, 8.507059e+37 }
 0x4a1   : > { %v1124_v29 = vadd.f32 %v2431_v21, %v1123_v26 }
 0x4a2   : > { %v2433_v27 = vpop.eup %2432 }
 0x4a3   : > { %v2435_v28 = vpop.eup %2434  ;;  %v1136_v30 = vmul.f32 %v2433_v27, %v1101_v23  ;;  %v2862_v31 = vpop.xlane.xlu0 %1106  ;;  %v1128_v41 = vsel %vm2867_vm1, %v2431_v21, %v1124_v29  ;;  %vm1141_vm4 = vweird.f32 %v2433_v27 }
 0x4a4   : > { %v1151_v33 = vmul.f32 %v2435_v28, %v1104_v24  ;;  %2436 = vrcp.f32 %v2862_v31  ;;  %v2865_v34 = vpop.xlane.xlu1 %1115  ;;  %vm1156_vm5 = vweird.f32 %v2435_v28  ;;  %v1133_v49 = vsel %vm1130_vm6, %v1132_v44, %v1128_v41  ;;  %vm1142_vm9 = vmor %vm1140_vm8, %vm1141_vm4 }
 0x4a5   : > { %v1137_v36 = vsub.f32 1.0, %v1136_v30  ;;  %2438 = vrcp.f32 %v2865_v34  ;;  %vm2874_vm10 = vmor %vm1155_vm7, %vm1156_vm5  ;;  %v1134_v1 = vmul.f32 %v2830_v52, %v1133_v49  ;;  %v1174_v5 = vand.u32 2147483647, %v2862_v31 }
 0x4a6   : > { %v1152_v39 = vsub.f32 1.0, %v1151_v33  ;;  %v1176_v7 = vand.u32 2147483648, %v2862_v31  ;;  %vm1170_vm0 = vweird.f32 %v2862_v31  ;;  %vm1215_vm1 = vweird.f32 %v2865_v34 }
 0x4a7   : > { %v1138_v42 = vmul.f32 %v2433_v27, %v1137_v36  ;;  %v1240_v52 = vpack.c.bf16 %v1134_v1, %v1134_v1  ;;  %v1219_v16 = vand.u32 2147483647, %v2865_v34  ;;  %v1221_v21 = vand.u32 2147483648, %v2865_v34 }
 0x4a8   : > { %v1153_v45 = vmul.f32 %v2435_v28, %v1152_v39  ;;  %v1177_v20 = vor.u32 1.1754944e-38, %v1176_v7  ;;  %vm1175_vm6 = vcmp.eq.f32.partialorder %v1174_v5, 8.507059e+37 }
 0x4a9   : > { %v1139_v47 = vadd.f32 %v2433_v27, %v1138_v42  ;;  %v1250_v29 = vunpack.c.l.b16 %v1240_v52  ;;  %vm1220_vm8 = vcmp.eq.f32.partialorder %v1219_v16, 8.507059e+37  ;;  %v1222_v36 = vor.u32 1.1754944e-38, %v1221_v21 }
 0x4aa   : > { %v2437_v48 = vpop.eup %2436  ;;  %v1154_v50 = vadd.f32 %v2435_v28, %v1153_v45 }
 0x4ab   : > { %v1143_v55 = vsel %vm1142_vm9, %v2433_v27, %v1139_v47  ;;  %v1166_v56 = vmul.f32 %v2437_v48, %v2862_v31  ;;  %v2879_v57 = vpop.xlane.xlu0 %1118  ;;  %v2439_v58 = vpop.eup %2438  ;;  %vm1171_vm15 = vweird.f32 %v2437_v48 }
 0x4ac   : > { %v1158_v59 = vsel %vm2874_vm10, %v2435_v28, %v1154_v50  ;;  %v1148_v62 = vsel %vm1145_vm11, %v1147_v53, %v1143_v55  ;;  %2440 = vrcp.f32 %v2879_v57  ;;  %v2884_v63 = vpop.xlane.xlu1 %1109  ;;  %v1211_v4 = vmul.f32 %v2439_v58, %v2865_v34  ;;  %vm1172_vm4 = vmor %vm1170_vm0, %vm1171_vm15 }
 0x4ad   : > { %v1149_v2 = vmul.f32 %v2834_v61, %v1148_v62  ;;  %v1167_v3 = vsub.f32 1.0, %v1166_v56  ;;  %v1163_v9 = vsel %vm1160_vm14, %v1162_v60, %v1158_v59  ;;  %2442 = vrcp.f32 %v2884_v63 }
 0x4ae   : > { %v1212_v11 = vsub.f32 1.0, %v1211_v4  ;;  %v1164_v19 = vmul.f32 %v2836_v0, %v1163_v9  ;;  %vm1216_vm5 = vweird.f32 %v2439_v58  ;;  %v1236_v28 = vand.u32 2147483648, %v2879_v57 }
 0x4af   : > { %v1168_v10 = vmul.f32 %v2437_v48, %v1167_v3  ;;  %v1241_v12 = vpack.c.bf16 %v1149_v2, %v1149_v2  ;;  %vm2906_vm7 = vmor %vm1215_vm1, %vm1216_vm5  ;;  %vm1230_vm10 = vweird.f32 %v2879_v57  ;;  %v1191_v46 = vand.u32 2147483648, %v2884_v63 }
 0x4b0   : > { %v1213_v13 = vmul.f32 %v2439_v58, %v1212_v11  ;;  %v1242_v33 = vpack.c.bf16 %v1164_v19, %v1164_v19  ;;  %v1237_v34 = vor.u32 1.1754944e-38, %v1236_v28  ;;  %v1189_v50 = vand.u32 2147483647, %v2884_v63 }
 0x4b1   : > { %v1169_v61 = vadd.f32 %v2437_v48, %v1168_v10  ;;  %v1251_v26 = vunpack.c.l.b16 %v1241_v12  ;;  %vm1185_vm0 = vweird.f32 %v2884_v63  ;;  %v1192_v59 = vor.u32 1.1754944e-38, %v1191_v46 }
 0x4b2   : > { %v2441_v17 = vpop.eup %2440  ;;  %v1214_v23 = vadd.f32 %v2439_v58, %v1213_v13 }
 0x4b3   : > { %v1173_v22 = vsel %vm1172_vm4, %v2437_v48, %v1169_v61  ;;  %v1226_v24 = vmul.f32 %v2441_v17, %v2879_v57  ;;  %v2899_v25 = vpop.xlane.xlu0 %1112  ;;  %v2443_v0 = vpop.eup %2442  ;;  %vm1231_vm9 = vweird.f32 %v2441_v17  ;;  %v1252_v42 = vpack.c.b16 %v1251_v26, %v1250_v29 }
 0x4b4   : > { %v1178_v27 = vsel %vm1175_vm6, %v1177_v20, %v1173_v22  ;;  %2444 = vrcp.f32 %v2899_v25  ;;  %v1218_v35 = vsel %vm2906_vm7, %v2439_v58, %v1214_v23  ;;  %v1181_v37 = vmul.f32 %v2443_v0, %v2884_v63  ;;  %vm1232_vm11 = vmor %vm1230_vm10, %vm1231_vm9 }
 0x4b5   : > { %v1179_v30 = vmul.f32 %v2844_v8, %v1178_v27  ;;  %v1227_v32 = vsub.f32 1.0, %v1226_v24  ;;  %v1234_v8 = vand.u32 2147483647, %v2879_v57  ;;  %v1223_v44 = vsel %vm1220_vm8, %v1222_v36, %v1218_v35  ;;  %2159 = vmatmul.msk.bf16.vlgmr.msra.gmra.mxu2 %vm1046_vm13, %v1252_v42 }
 0x4b6   : > { %v1182_v41 = vsub.f32 1.0, %v1181_v37  ;;  %v1275_v48 = vunpack.c.l.b16 %v1242_v33  ;;  %vm1186_vm14 = vweird.f32 %v2443_v0  ;;  %v1224_v54 = vmul.f32 %v2842_v6, %v1223_v44 }
 0x4b7   : > { %v1243_v39 = vpack.c.bf16 %v1179_v30, %v1179_v30  ;;  %v1228_v40 = vmul.f32 %v2441_v17, %v1227_v32  ;;  %vm1235_vm15 = vcmp.eq.f32.partialorder %v1234_v8, 8.507059e+37  ;;  %vm1187_vm1 = vmor %vm1185_vm0, %vm1186_vm14  ;;  %vm1190_vm4 = vcmp.eq.f32.partialorder %v1189_v50, 8.507059e+37 }
 0x4b8   : > { %v1183_v49 = vmul.f32 %v2443_v0, %v1182_v41  ;;  %v1204_v1 = vand.u32 2147483647, %v2899_v25  ;;  %v1206_v2 = vand.u32 2147483648, %v2899_v25  ;;  %v1246_v6 = vpack.c.bf16 %v1224_v54, %v1224_v54 }
 0x4b9   : > { %v1276_v43 = vunpack.c.l.b16 %v1243_v39  ;;  %v1229_v45 = vadd.f32 %v2441_v17, %v1228_v40  ;;  %vm1200_vm6 = vweird.f32 %v2899_v25  ;;  %v2553_v23 = vmov 1983009808  }
 0x4ba   : > { %v2445_v47 = vpop.eup %2444  ;;  %v1184_v56 = vadd.f32 %v2443_v0, %v1183_v49  ;;  %v1207_v9 = vor.u32 1.1754944e-38, %v1206_v2  ;;  %vm1205_vm8 = vcmp.eq.f32.partialorder %v1204_v1, 8.507059e+37  ;;  %v1325_v11 = vunpack.c.l.b16 %v1246_v6 }
 0x4bb   : > { %v1233_v51 = vsel %vm1232_vm11, %v2441_v17, %v1229_v45  ;;  %v1196_v53 = vmul.f32 %v2445_v47, %v2899_v25  ;;  %v1277_v57 = vpack.c.b16 %v1276_v43, %v1275_v48  ;;  %vm1201_vm5 = vweird.f32 %v2445_v47 }
 0x4bc   : > { %v1238_v55 = vsel %vm1235_vm15, %v1237_v34, %v1233_v51  ;;  %v1188_v62 = vsel %vm1187_vm1, %v2443_v0, %v1184_v56  ;;  %vm1202_vm7 = vmor %vm1200_vm6, %vm1201_vm5  ;;  %v1354_v24 = vunpack.c.l.s4 %v2553_v23  ;;  %vm1349_vm9 = vcmask 1047556  }
 0x4bd   : > { %v1239_v58 = vmul.f32 %v2850_v14, %v1238_v55  ;;  %v1197_v60 = vsub.f32 1.0, %v1196_v53  ;;  %2160 = vmatmul.msk.bf16.vlgmr.msra.gmra.mxu3 %vm1046_vm13, %v1277_v57  ;;  %v1193_v3 = vsel %vm1190_vm4, %v1192_v59, %v1188_v62  ;;  %v2554_v29 = vmov 1934713408  }
 0x4be   : > { %v1194_v5 = vmul.f32 %v2852_v15, %v1193_v3  ;;  %v2930_v26 = vunpack.c.0.s8 %v1354_v24  ;;  %v1378_v30 = vunpack.c.l.s4 %v2554_v29  ;;  %vm1532_vm10 = vcmask 195584  }
 0x4bf   : > { %v1247_v63 = vpack.c.bf16 %v1239_v58, %v1239_v58  ;;  %v1198_v4 = vmul.f32 %v2445_v47, %v1197_v60 }
 0x4c0   : > { %v1244_v52 = vpack.c.bf16 %v1194_v5, %v1194_v5  ;;  %v2937_v40 = vunpack.c.0.s8 %v1378_v30 }
 0x4c1   : > { %v1199_v7 = vadd.f32 %v2445_v47, %v1198_v4  ;;  %v1326_v14 = vunpack.c.l.b16 %v1247_v63 }
 0x4c2   : > { %v1300_v17 = vunpack.c.l.b16 %v1244_v52 }
 0x4c3   : > { %v1203_v10 = vsel %vm1202_vm7, %v2445_v47, %v1199_v7  ;;  %v1327_v13 = vpack.c.b16 %v1326_v14, %v1325_v11 }
 0x4c4   : > { %v1208_v12 = vsel %vm1205_vm8, %v1207_v9, %v1203_v10 }
 0x4c5   : > { %v1209_v61 = vmul.f32 %v2858_v18, %v1208_v12  ;;  %2162 = vmatmul.msk.bf16.vlgmr.msrb.gmra.mxu2 %vm1046_vm13, %v1327_v13 }
 0x4c7   : > { %v1245_v16 = vpack.c.bf16 %v1209_v61, %v1209_v61 }
 0x4c9   : > { %v1301_v19 = vunpack.c.l.b16 %v1245_v16 }
 0x4cb   : > { %v1302_v15 = vpack.c.b16 %v1301_v19, %v1300_v17 }
 0x4cd   : > { %2161 = vmatmul.msk.bf16.vlgmr.msrb.gmra.mxu3 %vm1046_vm13, %v1302_v15  ;;  %vm1529_vm13 = vcmask 130048  }
 0x538   : > { %v1268_v20 = vpop.f32.mrf.mxu2 }
 0x539   : > { %v1351_v32 = vrot.slane %v1268_v20, 4 }
 0x540   : > { %v1293_v21 = vpop.f32.mrf.mxu3  ;;  %v1270_v22 = vpop.f32.mrf.mxu2 }
 0x541   : > { %v1363_v27 = vrot.slane %v1293_v21, 4 }
 0x548   : > { %v1295_v25 = vpop.f32.mrf.mxu3  ;;  %v1343_v18 = vpop.f32.mrf.mxu2 }
 0x549   : > { %v1361_v28 = vrot.slane %v1343_v18, 4  ;;  %v1364_v0 = vsel %vm1349_vm9, %v1343_v18, %v1363_v27 }
 0x54a   : > { %v1372_v31 = vperm.slane %v1364_v0, %v2930_v26 }
 0x54b   : > { %v1362_v33 = vsel %vm1349_vm9, %v1361_v28, %v1293_v21 }
 0x54c   : > { %v1368_v35 = vperm.slane %v1362_v33, %v2930_v26  ;;  %v1385_v8 = vrot.slane %v1372_v31, 4 }
 0x54e   : > { %v1373_v42 = vrot.slane %v1368_v35, 4 }
 0x550   : > { %v1318_v36 = vpop.f32.mrf.mxu3  ;;  %v1345_v46 = vpop.f32.mrf.mxu2 }
 0x551   : > { %v1348_v37 = vrot.slane %v1318_v36, 4  ;;  %v1352_v39 = vsel %vm1349_vm9, %v1318_v36, %v1351_v32  ;;  %v1411_v48 = vrot.slane %v1345_v46, 4 }
 0x552   : > { %v1360_v34 = vperm.slane %v1352_v39, %v2930_v26 }
 0x553   : > { %v1350_v41 = vsel %vm1349_vm9, %v1348_v37, %v1268_v20  ;;  %v1412_v55 = vsel %vm1349_vm9, %v1411_v48, %v1295_v25 }
 0x554   : > { %v1356_v43 = vperm.slane %v1350_v41, %v2930_v26  ;;  %v1386_v44 = vsel %vm1349_vm9, %v1385_v8, %v1360_v34  ;;  %v1387_v45 = vrot.slane %v1360_v34, 4  ;;  %v1416_v62 = vperm.slane %v1412_v55, %v2930_v26 }
 0x555   : > { %v1392_v47 = vperm.slane %v1386_v44, %v2937_v40 }
 0x556   : > { %v1374_v49 = vsel %vm1349_vm9, %v1373_v42, %v1356_v43  ;;  %v1375_v50 = vrot.slane %v1356_v43, 4  ;;  %v1388_v51 = vsel %vm1349_vm9, %v1372_v31, %v1387_v45  ;;  %v1417_v11 = vrot.slane %v1416_v62, 4 }
 0x557   : > { %v1380_v53 = vperm.slane %v1374_v49, %v2937_v40  ;;  %v1396_v54 = vperm.slane %v1388_v51, %v2937_v40  ;;  %v1401_v57 = vrot.slane %v1392_v47, 4 }
 0x558   : > { %v1376_v56 = vsel %vm1349_vm9, %v1368_v35, %v1375_v50  ;;  %v1320_v58 = vpop.f32.mrf.mxu3 }
 0x559   : > { %v1384_v59 = vperm.slane %v1376_v56, %v2937_v40  ;;  %v1403_v60 = vrot.slane %v1396_v54, 4  ;;  %v1405_v1 = vrot.slane %v1320_v58, 4  ;;  %v1397_v2 = vrot.slane %v1380_v53, 4 }
 0x55a   : > { %v1402_v6 = vsel %vm1349_vm9, 0.0, %v1401_v57 }
 0x55b   : > { %v1399_v63 = vrot.slane %v1384_v59, 4  ;;  %v1404_v3 = vsel %vm1349_vm9, 0.0, %v1403_v60  ;;  %v1434_v4 = vsel %vm1349_vm9, %v1403_v60, %v1392_v47  ;;  %v1406_v14 = vsel %vm1349_vm9, %v1405_v1, %v1270_v22  ;;  %v2267_v60 = vld [vmem:[%s2722_s20] sm:$0xff] }
 0x55c   : > { %v1438_v5 = vperm.slane %v1434_v4, %v2930_v26  ;;  %v1439_v7 = vrot.slane %v1404_v3, 4  ;;  %v1410_v12 = vperm.slane %v1406_v14, %v2930_v26  ;;  %v1398_v17 = vsel %vm1349_vm9, 0.0, %v1397_v2 }
 0x55d   : > { %v1400_v9 = vsel %vm1349_vm9, 0.0, %v1399_v63  ;;  %v1423_v10 = vsel %vm1349_vm9, %v1399_v63, %v1380_v53  ;;  %v1554_v62 = vsel %vm637_vm2, %v2267_v60, 0 }
 0x55e   : > { %v1428_v52 = vrot.slane %v1400_v9, 4  ;;  %v1440_v61 = vsel %vm1349_vm9, %v1439_v7, %v1402_v6  ;;  %v1459_v13 = vrot.slane %v1438_v5, 4  ;;  %v1427_v16 = vperm.slane %v1423_v10, %v2930_v26 }
 0x55f   : > { %v1444_v19 = vperm.slane %v1440_v61, %v2930_v26  ;;  %v1418_v15 = vsel %vm1349_vm9, %v1417_v11, %v1410_v12 }
 0x560   : > { %v1422_v20 = vperm.slane %v1418_v15, %v2937_v40  ;;  %v1429_v21 = vsel %vm1349_vm9, %v1428_v52, %v1398_v17  ;;  %v1447_v22 = vrot.slane %v1427_v16, 4  ;;  %v2450_v17 = vld [vmem:[#allocation2] sm:$0xff] }
 0x561   : > { %v1433_v23 = vperm.slane %v1429_v21, %v2930_v26  ;;  %v1460_v24 = vsel %vm1349_vm9, %v1444_v19, %v1459_v13  ;;  %v1457_v25 = vrot.slane %v1444_v19, 4  ;;  %v2451_v21 = vld [vmem:[#allocation2 + $0x8] sm:$0x3] }
 0x562   : > { %v1481_v27 = vrot.slane %v1422_v20, 4  ;;  %v1468_v18 = vperm.slane %v1460_v24, %v2937_v40  ;;  %v1480_v28 = vperm.slane %v1422_v20, %v2930_v26  ;;  %v2276_v24 = vld [vmem:[%s2737_s24 + $0x38] sm:$0xff] }
 0x563   : > { %v1448_v0 = vsel %vm1349_vm9, %v1433_v23, %v1447_v22  ;;  %v1445_v29 = vrot.slane %v1433_v23, 4  ;;  %v1458_v30 = vsel %vm1349_vm9, %v1457_v25, %v1438_v5  ;;  %v1707_v25 = vsel %vm637_vm2, %v2276_v24, 0 }
 0x564   : > { %v1456_v31 = vperm.slane %v1448_v0, %v2937_v40  ;;  %v1482_v32 = vsel %vm1349_vm9, 0.0, %v1481_v27  ;;  %v1489_v33 = vrot.slane %v1480_v28, 4  ;;  %v1473_v35 = vrot.slane %v1468_v18, 4  ;;  %1709 = vmatpush.bf16.xpose.msrb.mxu1 %v1707_v25  ;;  %v2275_v27 = vld [vmem:[%s2737_s24 + $0x30] sm:$0xff] }
 0x565   : > { %v1486_v36 = vperm.slane %v1482_v32, %v2930_v26  ;;  %v1446_v37 = vsel %vm1349_vm9, %v1445_v29, %v1427_v16  ;;  %v1464_v39 = vperm.slane %v1458_v30, %v2937_v40  ;;  %v2273_v32 = vld [vmem:[%s2737_s24 + $0x20] sm:$0xff] }
 0x566   : > { %v1452_v8 = vperm.slane %v1446_v37, %v2937_v40  ;;  %v1474_v44 = vsel %vm1349_vm9, %v1473_v35, %v1456_v31  ;;  %v1475_v55 = vrot.slane %v1456_v31, 4  ;;  %v1698_v37 = vsel %vm637_vm2, %v2273_v32, 0 }
 0x567   : > { %v1487_v34 = vrot.slane %v1486_v36, 4  ;;  %v1490_v41 = vsel %vm1349_vm9, %v1486_v36, %v1489_v33  ;;  %v1469_v42 = vrot.slane %v1464_v39, 4 }
 0x568   : > { %v1498_v43 = vperm.slane %v1490_v41, %v2937_v40  ;;  %v1471_v26 = vrot.slane %v1452_v8, 4  ;;  %v1476_v57 = vsel %vm1349_vm9, %v1468_v18, %v1475_v55  ;;  %v1704_v18 = vsel %vm637_vm2, %v2275_v27, 0 }
 0x569   : > { %v1488_v45 = vsel %vm1349_vm9, %v1487_v34, %v1480_v28  ;;  %v1470_v46 = vsel %vm1349_vm9, %v1469_v42, %v1452_v8  ;;  %v2274_v28 = vld [vmem:[%s2737_s24 + $0x28] sm:$0xff]  ;;  %v2272_v42 = vld [vmem:[%s2737_s24 + $0x18] sm:$0xff] }
 0x56a   : > { %v2391_v47 = vpack.i.bf16 %v1498_v43, %v1474_v44  ;;  %v1494_v48 = vperm.slane %v1488_v45, %v2937_v40  ;;  %v1472_v50 = vsel %vm1349_vm9, %v1464_v39, %v1471_v26  ;;  %v1501_v54 = vrot.slane %v1498_v43, 4  ;;  %v2268_v40 = vld [vmem:[%s2722_s20 + $0x8] sm:$0xff]  ;;  %v2271_v44 = vld [vmem:[%s2737_s24 + $0x10] sm:$0xff]  ;;  %v2269_v26 = vld [vmem:[%s2737_s24] sm:$0xff] }
 0x56b   : > { %v1557_v59 = vsel %vm637_vm2, %v2268_v40, 0  ;;  %v1701_v29 = vsel %vm637_vm2, %v2274_v28, 0  ;;  %v1695_v43 = vsel %vm637_vm2, %v2272_v42, 0  ;;  %v1692_v45 = vsel %vm637_vm2, %v2271_v44, 0 }
 0x56c   : > { %2392 = vrot.lane.b32.xlu0 %v2391_v47, %s2555_s12  ;;  %v1499_v49 = vrot.slane %v1494_v48, 4  ;;  %v1502_v56 = vsel %vm1349_vm9, 0.0, %v1501_v54  ;;  %1565 = vmatpush.bf16.xpose.msra.mxu3 %v1557_v59 }
 0x56d   : > { %v2401_v58 = vpack.i.bf16 %v1502_v56, %v1476_v57  ;;  %1710 = vmatpush.bf16.xpose.msrb.mxu1 %v1704_v18 }
 0x56e   : > { %v1500_v51 = vsel %vm1349_vm9, 0.0, %v1499_v49 }
 0x56f   : > { %v2396_v53 = vpack.i.bf16 %v1500_v51, %v1472_v50  ;;  %v1686_v50 = vsel %vm637_vm2, %v2269_v26, 0 }
 0x571   : > { %2397 = vrot.lane.b32.xlu1 %v2396_v53, %s2556_s21  ;;  %v2278_v53 = vld [vmem:[%s2742_s13 + $0x8] sm:$0xff] }
 0x572   : > { %1748 = vmatpush.bf16.xpose.msra.mxu2 %v2278_v53 }
 0x574   : > { %1566 = vmatpush.bf16.xpose.msra.mxu3 %v1554_v62 }
 0x575   : > { %1711 = vmatpush.bf16.xpose.msrb.mxu1 %v1701_v29 }
 0x579   : > { %2402 = vrot.lane.b32.xlu1 %v2401_v58, %s2557_s22 }
 0x57d   : > { %1712 = vmatpush.bf16.xpose.msrb.mxu1 %v1698_v37 }
 0x585   : > { %1713 = vmatpush.bf16.xpose.msrb.mxu1 %v1695_v43 }
 0x58d   : > { %1714 = vmatpush.bf16.xpose.msrb.mxu1 %v1692_v45 }
 0x5de   : > { %v2393_v3 = vpop.permute.xlu0 %2392 }
 0x5df   : > { %v2395_v5 = vunpack.i.h.bf16 %v2393_v3  ;;  %v2394_v7 = vunpack.i.l.bf16 %v2393_v3 }
 0x5e3   : > { %v2398_v1 = vpop.permute.xlu1 %2397 }
 0x5e4   : > { %v2400_v2 = vunpack.i.h.bf16 %v2398_v1  ;;  %v2399_v63 = vunpack.i.l.bf16 %v2398_v1 }
 0x5e6   : > { %v1528_v4 = vsel %vm949_vm12, %v1494_v48, %v2400_v2  ;;  %v1527_v6 = vsel %vm949_vm12, %v1470_v46, %v2399_v63  ;;  %v2270_v46 = vld [vmem:[%s2737_s24 + $0x8] sm:$0xff]  ;;  %s3186_s24 = sld [smem:[#allocation19_spill]] (!%p2213_p1) }
 0x5e7   : > { %v1530_v11 = vsel %vm1529_vm13, %v1527_v6, %v2394_v7  ;;  %v1531_v12 = vsel %vm1529_vm13, %v1528_v4, %v2395_v5  ;;  %v1689_v47 = vsel %vm637_vm2, %v2270_v46, 0 }
 0x5e8   : > { %1715 = vmatpush.bf16.xpose.msrb.mxu1 %v1689_v47 }
 0x5eb   : > { %v2403_v14 = vpop.permute.xlu1 %2402 }
 0x5ec   : > { %v2405_v9 = vunpack.i.h.bf16 %v2403_v14  ;;  %v2404_v10 = vunpack.i.l.bf16 %v2403_v14  ;;  %v2407_v14 = vld [vmem:[%s548_s18] ss:$0 sm:$0xff] }
 0x5ee   : > { %v1533_v52 = vsel %vm1532_vm10, %v1530_v11, %v2404_v10  ;;  %v1534_v61 = vsel %vm1532_vm10, %v1531_v12, %v2405_v9 }
 0x5ef   : > { %v1535_v13 = vpack.c.bf16 %v1534_v61, %v1533_v52  ;;  %v2277_v61 = vld [vmem:[%s2742_s13] sm:$0xff]  ;;  %s3187_s13 = sld [smem:[#allocation20_spill]] (!%p2213_p1) }
 0x5f0   : > { %1716 = vmatpush.bf16.xpose.msrb.mxu1 %v1686_v50  ;;  %1749 = vmatpush.bf16.xpose.msra.mxu2 %v2277_v61 }
 0x5f1   : > { %2171 = vmatmul.msk.bf16.vlgmr.msra.gmra.mxu3 %vm637_vm2, %v1535_v13 }
 0x674   : > { %v1568_v16 = vpop.f32.mrf.mxu3 }
 0x675   : > { %v2996_v19 = vadd.f32 %v2450_v17, %v1568_v16 }
 0x677   : > { %v1576_v15 = vsel %vm637_vm2, %v2996_v19, 0.0 }
 0x678   : > { %1577 = vadd.xlane.f32.xlu0 %v1576_v15 }
 0x67c   : > { %v1570_v20 = vpop.f32.mrf.mxu3 }
 0x67d   : > { %v3000_v22 = vadd.f32 %v2451_v21, %v1570_v20 }
 0x67f   : > { %v1579_v23 = vsel %vm641_vm3, %v3000_v22, 0.0 }
 0x680   : > { %1580 = vadd.xlane.f32.xlu1 %v1579_v23 }
 0x6eb   : > { %v1578_v0 = vpop.xlane.xlu0 %1577 }
 0x6ec   : > { %v1582_v30 = vmul.f32 %v1578_v0, %v2782_v38 }
 0x6ee   : > { %v1584_v31 = vsub.f32 %v2996_v19, %v1582_v30 }
 0x6f0   : > { %v1586_v33 = vmul.f32 %v1584_v31, %v1584_v31 }
 0x6f2   : > { %v1588_v35 = vsel %vm637_vm2, %v1586_v33, 0.0 }
 0x6f3   : > { %1589 = vadd.xlane.f32.xlu0 %v1588_v35  ;;  %v1581_v36 = vpop.xlane.xlu1 %1580 }
 0x6f4   : > { %v1583_v39 = vmul.f32 %v1581_v36, %v2782_v38 }
 0x6f6   : > { %v1585_v8 = vsub.f32 %v3000_v22, %v1583_v39 }
 0x6f8   : > { %v1587_v34 = vmul.f32 %v1585_v8, %v1585_v8 }
 0x6fa   : > { %v1591_v41 = vsel %vm641_vm3, %v1587_v34, 0.0 }
 0x6fb   : > { %1592 = vadd.xlane.f32.xlu2 %v1591_v41 }
 0x766   : > { %v1590_v48 = vpop.xlane.xlu0 %1589 }
 0x767   : > { %v1594_v49 = vmul.f32 %v1590_v48, %v2782_v38 }
 0x769   : > { %v1596_v51 = vadd.f32 1e-05, %v1594_v49 }
 0x76b   : > { %2446 = vrsqrt.f32 %v1596_v51  ;;  %vm1604_vm11 = vweird.f32 %v1596_v51 }
 0x76e   : > { %v1593_v54 = vpop.xlane.xlu2 %1592 }
 0x76f   : > { %v1595_v55 = vmul.f32 %v1593_v54, %v2782_v38 }
 0x771   : > { %v2447_v56 = vpop.eup %2446  ;;  %v1597_v57 = vadd.f32 1e-05, %v1595_v55 }
 0x772   : > { %v1599_v58 = vmul.f32 %v2447_v56, %v1596_v51  ;;  %vm1605_vm12 = vweird.f32 %v2447_v56 }
 0x773   : > { %2448 = vrsqrt.f32 %v1597_v57  ;;  %vm1606_vm14 = vmor %vm1604_vm11, %vm1605_vm12  ;;  %vm1614_vm0 = vweird.f32 %v1597_v57 }
 0x774   : > { %v1600_v40 = vmul.f32 %v2447_v56, %v1599_v58 }
 0x776   : > { %v1601_v59 = vmul.f32 0.5, %v1600_v40 }
 0x778   : > { %v1602_v60 = vsub.f32 1.5, %v1601_v59 }
 0x779   : > { %v2449_v62 = vpop.eup %2448 }
 0x77a   : > { %v1609_v1 = vmul.f32 %v2449_v62, %v1597_v57  ;;  %v1603_v2 = vmul.f32 %v2447_v56, %v1602_v60  ;;  %vm1615_vm15 = vweird.f32 %v2449_v62 }
 0x77b   : > { %vm1616_vm1 = vmor %vm1614_vm0, %vm1615_vm15 }
 0x77c   : > { %v1610_v63 = vmul.f32 %v2449_v62, %v1609_v1  ;;  %v1607_v4 = vsel %vm1606_vm14, %v2447_v56, %v1603_v2 }
 0x77d   : > { %v1618_v7 = vmul.f32 %v1607_v4, %v1584_v31 }
 0x77e   : > { %v1611_v3 = vmul.f32 0.5, %v1610_v63 }
 0x77f   : > { %v1623_v11 = vmul.f32 %v2407_v14, %v1618_v7 }
 0x780   : > { %v1612_v6 = vsub.f32 1.5, %v1611_v3 }
 0x782   : > { %v1613_v5 = vmul.f32 %v2449_v62, %v1612_v6 }
 0x784   : > { %v1617_v9 = vsel %vm1616_vm1, %v2449_v62, %v1613_v5 }
 0x785   : > { %v1619_v10 = vmul.f32 %v1617_v9, %v1585_v8 }
 0x787   : > { %v1624_v12 = vmul.f32 %v2407_v14, %v1619_v10 }
 0x789   : > { %v1625_v52 = vpack.c.bf16 %v1624_v12, %v1623_v11 }
 0x78b   : > { %2204 = vmatmul.msk.bf16.vlgmr.msrb.gmra.mxu1 %vm637_vm2, %v1625_v52 }
 0x808   : > { %v1718_v13 = vpop.f32.mrf.mxu1 }
 0x809   : > { %v1723_v17 = vmax.f32 %v1718_v13, 0.0 }
 0x810   : > { %v1720_v16 = vpop.f32.mrf.mxu1 }
 0x811   : > { %v1724_v15 = vmax.f32 %v1720_v16, 0.0 }
 0x813   : > { %v1725_v20 = vpack.c.bf16 %v1724_v15, %v1723_v17 }
 0x815   : > { %1750 = vmatmul.bf16.vlgmr.msra.gmra.mxu2 %v1725_v20 }
 0x898   : > { %v1751_v21 = vpop.f32.mrf.mxu2 }
 0x899   : > { %v1756_v23 = vadd.f32 %v1751_v21, %v2996_v19 }
 0x89b   : > { %1758 = vst.msk [vmem:[#allocation2] sm:$0xff] %vm637_vm2, %v1756_v23 }
 0x89f   : > { %1763 = sbr.rel (%p2213_p1) target bundleno = 2644 (0xa54), region = 80 }
 0x8a0   : > { %v1753_v24 = vpop.f32.mrf.mxu2 }
 0x8a1   : > { %v1757_v25 = vadd.f32 %v1753_v24, %v3000_v22 }
 0x8a3   : > { %1759 = vst.msk [vmem:[#allocation2 + $0x8] sm:$0x3] %vm641_vm3, %v1757_v25 }
 0x8a4   : > { %v1765_v27 = vrot.slane %v1756_v23, 5  ;;  %1768 = vst [vmem:[#allocation1] ss:$9 sm:$0xff] %v1756_v23  ;;  %v2286_v19 = vld [vmem:[%s3143_s11 + $0x38] sm:$0xff]  ;;  %v2285_v22 = vld [vmem:[%s3143_s11 + $0x30] sm:$0xff]  ;;  %v2284_v30 = vld [vmem:[%s3143_s11 + $0x28] sm:$0xff] }
 0x8a5   : > { %v1917_v0 = vsel %vm637_vm2, %v2286_v19, 0  ;;  %v1914_v29 = vsel %vm637_vm2, %v2285_v22, 0  ;;  %v1911_v36 = vsel %vm637_vm2, %v2284_v30, 0  ;;  %v2283_v41 = vld [vmem:[%s3143_s11 + $0x20] sm:$0xff]  ;;  %v2282_v45 = vld [vmem:[%s3143_s11 + $0x18] sm:$0xff]  ;;  %v2281_v47 = vld [vmem:[%s3143_s11 + $0x10] sm:$0xff] }
 0x8a6   : > { %1770 = vst [vmem:[#allocation1 + $0x1] ss:$9 sm:$0xff] %v1765_v27  ;;  %1919 = vmatpush.bf16.xpose.msra.mxu0 %v1917_v0  ;;  %v1908_v42 = vsel %vm637_vm2, %v2283_v41, 0  ;;  %v1905_v46 = vsel %vm637_vm2, %v2282_v45, 0  ;;  %v1902_v26 = vsel %vm637_vm2, %v2281_v47, 0  ;;  %v2280_v48 = vld [vmem:[%s3143_s11 + $0x8] sm:$0xff] }
 0x8a7   : > { %v1899_v49 = vsel %vm637_vm2, %v2280_v48, 0  ;;  %v2279_v50 = vld [vmem:[%s3143_s11] sm:$0xff]  ;;  %vm1849_vm6 = vcmask 1041409  }
 0x8a8   : > { %v1896_v51 = vsel %vm637_vm2, %v2279_v50, 0  ;;  %v2452_v60 = vld [vmem:[%s3186_s24] ss:$0 sm:$0xff] }
 0x8a9   : > { %v1818_v3 = vrot.slane %v2452_v60, 1  ;;  %v2453_v61 = vld [vmem:[%s3187_s13] ss:$0 sm:$0xff] }
 0x8ad   : > { %v1771_v18 = vld [vmem:[#allocation1] sm:$0xff] }
 0x8ae   : > { %v1773_v28 = vsel %vm641_vm3, %v1771_v18, 0.0  ;;  %1920 = vmatpush.bf16.xpose.msra.mxu0 %v1914_v29 }
 0x8af   : > { %1774 = vadd.xlane.f32.xlu0 %v1773_v28 }
 0x8b6   : > { %1921 = vmatpush.bf16.xpose.msra.mxu0 %v1911_v36 }
 0x8be   : > { %1922 = vmatpush.bf16.xpose.msra.mxu0 %v1908_v42 }
 0x8c6   : > { %1923 = vmatpush.bf16.xpose.msra.mxu0 %v1905_v46 }
 0x8ce   : > { %1924 = vmatpush.bf16.xpose.msra.mxu0 %v1902_v26 }
 0x8d6   : > { %1925 = vmatpush.bf16.xpose.msra.mxu0 %v1899_v49 }
 0x8de   : > { %1926 = vmatpush.bf16.xpose.msra.mxu0 %v1896_v51 }
 0x922   : > { %v1775_v31 = vpop.xlane.xlu0 %1774 }
 0x923   : > { %v1776_v32 = vmul.f32 %v1775_v31, %v2782_v38 }
 0x925   : > { %v1778_v33 = vperm.slane %v1776_v32, 0  ;;  %v1779_v35 = vperm.slane %v1776_v32, 1 }
 0x927   : > { %v1782_v37 = vsub.f32 %v1756_v23, %v1778_v33  ;;  %v1783_v39 = vsub.f32 %v1765_v27, %v1779_v35 }
 0x929   : > { %v1784_v8 = vmul.f32 %v1782_v37, %v1782_v37  ;;  %v1785_v34 = vmul.f32 %v1783_v39, %v1783_v39 }
 0x92b   : > { %1788 = vst [vmem:[#allocation1] ss:$9 sm:$0xff] %v1784_v8 }
 0x92c   : > { %1790 = vst [vmem:[#allocation1 + $0x1] ss:$9 sm:$0xff] %v1785_v34 }
 0x933   : > { %v1791_v43 = vld [vmem:[#allocation1] sm:$0xff] }
 0x934   : > { %v1793_v44 = vsel %vm641_vm3, %v1791_v43, 0.0 }
 0x935   : > { %1794 = vadd.xlane.f32.xlu0 %v1793_v44 }
 0x9a8   : > { %v1795_v53 = vpop.xlane.xlu0 %1794 }
 0x9a9   : > { %v1796_v54 = vmul.f32 %v1795_v53, %v2782_v38 }
 0x9ab   : > { %v1797_v55 = vadd.f32 1e-05, %v1796_v54 }
 0x9ad   : > { %2454 = vrsqrt.f32 %v1797_v55  ;;  %vm1804_vm4 = vweird.f32 %v1797_v55 }
 0x9b3   : > { %v2455_v56 = vpop.eup %2454 }
 0x9b4   : > { %v1799_v57 = vmul.f32 %v2455_v56, %v1797_v55  ;;  %vm1805_vm3 = vweird.f32 %v2455_v56 }
 0x9b5   : > { %vm1806_vm5 = vmor %vm1804_vm4, %vm1805_vm3 }
 0x9b6   : > { %v1800_v58 = vmul.f32 %v2455_v56, %v1799_v57 }
 0x9b8   : > { %v1801_v40 = vmul.f32 0.5, %v1800_v58 }
 0x9ba   : > { %v1802_v59 = vsub.f32 1.5, %v1801_v40 }
 0x9bc   : > { %v1803_v62 = vmul.f32 %v2455_v56, %v1802_v59 }
 0x9be   : > { %v1807_v1 = vsel %vm1806_vm5, %v2455_v56, %v1803_v62 }
 0x9bf   : > { %v1809_v2 = vperm.slane %v1807_v1, 0  ;;  %v1810_v63 = vperm.slane %v1807_v1, 1 }
 0x9c1   : > { %v1813_v38 = vmul.f32 %v1809_v2, %v1782_v37  ;;  %v1814_v4 = vmul.f32 %v1810_v63, %v1783_v39 }
 0x9c3   : > { %v1820_v6 = vmul.f32 %v2452_v60, %v1813_v38  ;;  %v1821_v5 = vmul.f32 %v1818_v3, %v1814_v4 }
 0x9c5   : > { %v1822_v7 = vpack.c.bf16 %v1820_v6, %v1820_v6  ;;  %v1823_v14 = vpack.c.bf16 %v1821_v5, %v1821_v5 }
 0x9c7   : > { %v1847_v9 = vunpack.c.l.b16 %v1823_v14  ;;  %v1846_v10 = vunpack.c.l.b16 %v1822_v7 }
 0x9c9   : > { %v1848_v11 = vrot.slane %v1847_v9, 7 }
 0x9cb   : > { %v1850_v12 = vsel %vm1849_vm6, %v1848_v11, %v1846_v10 }
 0x9cc   : > { %v1851_v52 = vpack.c.b16 %v1850_v12, %v1850_v12 }
 0x9ce   : > { %2246 = vmatmul.msk.bf16.vlgmr.msra.gmra.mxu0 %vm637_vm2, %v1851_v52 }
 0xa4b   : > { %v1928_v13 = vpop.f32.mrf.mxu0 }
 0xa4c   : > { %v1929_v16 = vadd.f32 %v2453_v61, %v1928_v13 }
 0xa4e   : > { %1932 = vst [vmem:[%s527_s15] sm:$0x3] %v1929_v16 }
 0xa53   : > { %v1930_v17 = vpop.f32.mrf.mxu0 }
 0xa54 PF: > { %s3188_s0 = sld [smem:[#allocation9_spill]]  ;;  %s1946_s26 = sshll.u32 %s527_s15, 4  ;;  %s1947_s26 = int_to_ptr.vmem [resolvable:$true] %s1946_s26 }
 0xa55   : > { %s3189_s28 = sld [smem:[#allocation7_spill]] }
 0xa56   : > { %s3191_s27 = sld [smem:[#allocation21_spill]] }
 0xa5a   : > { %s2248_s16 = sshll.u32 %s3188_s0, 1 }
 0xa5b   : > { %s3193_s12 = sand.u32 1, %s3189_s28  }
 0xa5c   : > { %s3192_s10 = smov %s3191_s27  ;;  %s1944_s14 = scalar_lea.hbm %s3191_s27, %s2248_s16 }
 0xa5d   : > { %s1948_s29 = sshll.u32 %s1944_s14, 4  ;;  %s1934_s21 = scalar_lea.sflag [#allocation4], %s3193_s12  ;;  %s1949_s29 = int_to_ptr.hbm [resolvable:$true] %s1948_s29 }
 0xa5e   : > { %s2470_s22 = sshra.s32 %s1949_s29, 4  ;;  %s2476_s18 = scalar_lea.hbm %s3192_s10, 4  ;;  %s2471_s22 = int_to_ptr.hbm [resolvable:$true] %s2470_s22 }
 0xa5f   : > { %s2472_s20 = scalar_lea.hbm %s2471_s22, 2  ;;  %p2477_p6 = scmp.lt.s32.totalorder %s2471_s22, %s3192_s10 }
 0xa60   : > { %p2473_p2 = scmp.ne.s32.totalorder %s2471_s22, %s2472_s20  ;;  %p2478_p7 = scmp.lt.s32.totalorder %s2476_s18, %s2472_s20 }
 0xa62   : > { %p2474_p4 = pnand %p2473_p2, %p2677_p3  ;;  %p2479_p8 = por %p2478_p7, %p2477_p6 }
 0xa64   : > { %p2475_p5 = pneg %p2474_p4 }
 0xa66   : > { %p2480_p10 = pnand %p2479_p8, %p2475_p5 }
 0xa68   : > { %2483 = shalt.err (!%p2480_p10)
}
 0xa69   : > { %2289 = dma.vmem_to_hbm [thread:$0]  (%p2677_p3), %s1947_s26, 32, %s1949_s29, %s1934_s21  }
 0xa6a PF: > { %s3194_s17 = sld [smem:[#allocation12_spill]] }
 0xa6b   : > { %s3195_s15 = sld [smem:[#allocation6_spill]] }
 0xa70   : > { %p2295_p11 = scmp.ge.s32.totalorder %s3194_s17, 2 }
 0xa71   : > { %s1960_s16 = sand.u32 1, %s3195_s15  }
 0xa72   : > { %p2292_p12 = pnand %p2295_p11, %p2687_p9  ;;  %s1961_s30 = scalar_lea.sflag [#allocation4], %s1960_s16 }
 0xa74   : > { %p2293_p13 = pneg %p2292_p12 }
 0xa76   : > { %2517 = dma.done.wait (%p2293_p13), %s1961_s30, 32  }
 0xa77   : > { %2519 = vsyncadd (%p2293_p13), %s1961_s30, 4294967264  ;;  %s26_s15 = sadd.s32 1, %s3194_s17   ;;  %s3197_s25 = sld [smem:[#allocation7_spill]] }
 0xa78   : > { %p23_p0 = scmp.ge.s32.totalorder %s26_s15, 6   ;;  %s3198_s26 = sld [smem:[#allocation8_spill]] }
 0xa79   : > { %s3199_s27 = sld [smem:[#allocation17_spill]] }
 0xa7a   : > { %s3200_s28 = sld [smem:[#allocation10_spill]]  ;;  %25 = sbr.rel (!%p23_p0) target bundleno = 10 (0xa), region = 135 }
 0xa7b   : > { %s3201_s29 = sld [smem:[#allocation11_spill]] }
 0xa7c   : > { %s3202_s30 = sld [smem:[#allocation13_spill]] }
 0xa7d   : > { %s3203_s14 = sld [smem:[#allocation15_spill]] }
 0xa7f   :  { %1967 = vsyncpa [#allocation4], 1 }
 0xa80   :  { %1969 = vsyncpa [#allocation4 + $0x1], 1 }

</bundles_post_ra>
